<compile_context>
chip_gen: v7x
topology: tpu7x:2x2x1
jax: 0.10.0
libtpu: 0.0.40
codegen_flags: <defaults>
</compile_context>

<pallas_src>
import functools

import jax
import jax.numpy as jnp
from jax.experimental import pallas as pl
from jax.experimental.pallas import tpu as pltpu

_LANE = 128
_SUBLANE = 8


def _round_up(x, m):
    return ((x + m - 1) // m) * m


@functools.partial(jax.jit, static_argnames=("tile_h",))
def vdsr_layer_lite(x, w, *, tile_h=None):
    """relu(conv2d(x, w, stride=1, padding=1, bias=None)).

    x: (N, Cin, H, W) NCHW (PyTorch layout), w: (Cout, Cin, 3, 3) OIHW.
    Returns (N, Cout, H, W) in x.dtype.
    """
    N, Cin, H, W = x.shape
    Cout, Cin_w, KH, KW = w.shape
    assert (Cin_w, KH, KW) == (Cin, 3, 3), "expected 3x3 conv weights matching Cin"

    cin_p = _round_up(Cin, _LANE)          # pad channels to the 128-lane width
    cout_p = _round_up(Cout, _LANE)
    wt = _round_up(W, _SUBLANE)            # sublane-aligned output width

    if tile_h is None:
        # keep the f32 accumulator (tile_h * wt * cout_p * 4 bytes) around <= 4 MiB
        cap = (4 * 1024 * 1024) // (wt * cout_p * 4)
        cap = max(_SUBLANE, (cap // _SUBLANE) * _SUBLANE)
        tile_h = min(_round_up(H, _SUBLANE), min(cap, 64))
    tile_h = max(_SUBLANE, _round_up(tile_h, _SUBLANE))
    nb = (H + tile_h - 1) // tile_h        # number of horizontal bands
    hp = nb * tile_h                       # padded output height
    wp_in = wt + 2                         # padded input width seen by the kernel

    # ---- host-side layout prep: NCHW -> NHWC, zero-pad spatial halo + channels ----
    xh = jnp.transpose(x, (0, 2, 3, 1)).astype(jnp.float32)
    x_pad = jnp.pad(xh, ((0, 0), (1, hp - H + 1), (1, wt - W + 1), (0, cin_p - Cin)))
    # weights: (Cout, Cin, 3, 3) -> (3, 3, cin_p, cout_p), zero padded
    w_p = jnp.transpose(w, (2, 3, 1, 0)).astype(jnp.float32)
    w_p = jnp.pad(w_p, ((0, 0), (0, 0), (0, cin_p - Cin), (0, cout_p - Cout)))

    def kernel(x_hbm, w_ref, o_ref, xband, sem):
        n = pl.program_id(0)
        b = pl.program_id(1)

        def start_band(slot, band):
            row0 = pl.multiple_of(band * tile_h, _SUBLANE)
            pltpu.make_async_copy(
                x_hbm.at[n, pl.ds(row0, tile_h + 2), :, :],
                xband.at[slot],
                sem.at[slot],
            ).start()

        slot = b % 2

        @pl.when(b == 0)                       # prime the pipeline at the start of each image
        def _():
            start_band(slot, b)

        @pl.when(b + 1 < pl.num_programs(1))   # prefetch the next band while computing this one
        def _():
            start_band((b + 1) % 2, b + 1)

        pltpu.make_async_copy(                 # wait for the current band's DMA
            x_hbm.at[n, pl.ds(0, tile_h + 2), :, :],
            xband.at[slot],
            sem.at[slot],
        ).wait()

        band = xband.at[slot]
        acc = jnp.zeros((tile_h * wt, cout_p), jnp.float32)
        for ky in range(3):                    # statically unrolled 3x3 taps -> 9 MXU matmuls
            for kx in range(3):
                xs = band[pl.ds(ky, tile_h), pl.ds(kx, wt), :]
                lhs = xs.reshape(tile_h * wt, cin_p)
                acc = acc + jnp.dot(lhs, w_ref[ky, kx],
                                    preferred_element_type=jnp.float32)
        out = jnp.maximum(acc, 0.0)            # fused ReLU on the f32 accumulator
        o_ref[...] = out.reshape(1, tile_h, wt, cout_p).astype(o_ref.dtype)

    # VMEM budget: input band double-buffer + resident weights + output double-buffer + acc
    band_bytes = 2 * (tile_h + 2) * wp_in * cin_p * 4
    w_bytes = 9 * cin_p * cout_p * 4
    out_bytes = 2 * tile_h * wt * cout_p * 4
    acc_bytes = tile_h * wt * cout_p * 4
    vmem_limit = int(min(max(2 * (band_bytes + w_bytes + out_bytes + acc_bytes),
                             32 * 1024 * 1024),
                         64 * 1024 * 1024))

    grid_spec = pltpu.PrefetchScalarGridSpec(
        num_scalar_prefetch=0,
        grid=(N, nb),
        in_specs=[
            pl.BlockSpec(memory_space=pl.ANY),                                # image stays in HBM
            pl.BlockSpec((3, 3, cin_p, cout_p), lambda n, b: (0, 0, 0, 0)),   # weights VMEM-resident
        ],
        out_specs=pl.BlockSpec((1, tile_h, wt, cout_p), lambda n, b: (n, b, 0, 0)),
        scratch_shapes=[
            pltpu.VMEM((2, tile_h + 2, wp_in, cin_p), jnp.float32),           # double-buffered band
            pltpu.SemaphoreType.DMA((2,)),
        ],
    )

    y_pad = pl.pallas_call(
        kernel,
        out_shape=jax.ShapeDtypeStruct((N, hp, wt, cout_p), jnp.float32),
        grid_spec=grid_spec,
        compiler_params=pltpu.CompilerParams(
            dimension_semantics=("parallel", "arbitrary"),
            vmem_limit_bytes=vmem_limit,
        ),
    )(x_pad, w_p)

    y = y_pad[:, :H, :W, :Cout]                # drop channel / spatial padding (lane-dense store,
    return jnp.transpose(y, (0, 3, 1, 2)).astype(x.dtype)   # slice back in the wrapper)


def _reference_conv3x3_relu(x, w):
    y = jax.lax.conv_general_dilated(
        x.astype(jnp.float32), w.astype(jnp.float32),
        window_strides=(1, 1), padding=((1, 1), (1, 1)),
        dimension_numbers=("NCHW", "OIHW", "NCHW"),
        precision=jax.lax.Precision.HIGHEST)
    return jnp.maximum(y, 0.0)


if __name__ == "__main__":
    key = jax.random.PRNGKey(0)
    kx, kw = jax.random.split(key)
    N, Cin, Cout, H, W = 2, 4, 8, 16, 16      # VDSRLayerLite(in_planes=4, out_planes=8)
    x = jax.random.normal(kx, (N, Cin, H, W), jnp.float32)
    w = jax.random.normal(kw, (Cout, Cin, 3, 3), jnp.float32) * 0.1

    y = jax.block_until_ready(vdsr_layer_lite(x, w, tile_h=8))   # tile_h=8 -> 2 bands, halo exercised
    y_ref = jax.block_until_ready(_reference_conv3x3_relu(x, w))

    assert y.shape == y_ref.shape == (N, Cout, H, W)
    max_err = float(jnp.max(jnp.abs(y - y_ref)))
    if max_err > 5e-2:
        raise AssertionError(f"Pallas output mismatch vs lax.conv reference: max|diff|={max_err}")
    print("KERNEL_OK")
</pallas_src>

<mosaic_0001>
module attributes {stable_mosaic.version = 11 : i64} {
  func.func @kernel(%arg0: i32, %arg1: i32, %arg2: memref<2x18x18x128xf32, #tpu.memory_space<any>>, %arg3: memref<3x3x128x128xf32, #tpu.memory_space<vmem>>, %arg4: memref<1x8x16x128xf32, #tpu.memory_space<vmem>>, %arg5: memref<2x10x18x128xf32, #tpu.memory_space<vmem>>, %arg6: memref<2x!tpu.dma_semaphore, #tpu.memory_space<semaphore_mem>>) attributes {dimension_semantics = [#tpu.dimension_semantics<parallel>, #tpu.dimension_semantics<arbitrary>], iteration_bounds = array<i64: 2, 2>, scalar_prefetch = 0 : i64, scratch_operands = 2 : i64, tpu.core_type = #tpu.core_type<tc>, window_params = [{}, {pipeline_mode = #tpu.pipeline_mode<synchronous>, transform_indices = @transform_1, window_bounds = array<i64: 3, 3, 128, 128>}, {transform_indices = @transform_2, window_bounds = array<i64: 1, 8, 16, 128>}]} {
    %c2_i32 = arith.constant 2 : i32
    %c0_i32 = arith.constant 0 : i32
    %0 = arith.cmpi eq, %c2_i32, %c0_i32 : i32
    %c1_i32 = arith.constant 1 : i32
    %1 = arith.select %0, %c1_i32, %c2_i32 : i32
    %2 = arith.remsi %arg1, %1 : i32
    %c0_i32_0 = arith.constant 0 : i32
    %3 = arith.cmpi ne, %2, %c0_i32_0 : i32
    %c0_i32_1 = arith.constant 0 : i32
    %4 = arith.cmpi slt, %2, %c0_i32_1 : i32
    %c0_i32_2 = arith.constant 0 : i32
    %5 = arith.cmpi slt, %1, %c0_i32_2 : i32
    %6 = arith.xori %4, %5 : i1
    %7 = arith.andi %6, %3 : i1
    %8 = arith.addi %2, %1 : i32
    %9 = arith.select %7, %8, %2 : i32
    %c0_i32_3 = arith.constant 0 : i32
    %10 = arith.cmpi eq, %arg1, %c0_i32_3 : i32
    %11 = arith.extui %10 : i1 to i32
    %c0_i32_4 = arith.constant 0 : i32
    %12 = arith.cmpi ne, %11, %c0_i32_4 : i32
    scf.if %12 {
      %c8_i32 = arith.constant 8 : i32
      %100 = arith.muli %arg1, %c8_i32 : i32
      %101 = tpu.assume_multiple %100, 8 : i32
      %c0_i32_115 = arith.constant 0 : i32
      %c0_i32_116 = arith.constant 0 : i32
      %102 = tpu.memref_slice %arg2[%arg0, %101, %c0_i32_115, %c0_i32_116] : memref<2x18x18x128xf32, #tpu.memory_space<any>> -> memref<1x10x18x128xf32, #tpu.memory_space<any>>
      %103 = tpu.memref_squeeze %102 : memref<1x10x18x128xf32, #tpu.memory_space<any>> -> memref<10x18x128xf32, #tpu.memory_space<any>>
      %c0_i32_117 = arith.constant 0 : i32
      %c0_i32_118 = arith.constant 0 : i32
      %c0_i32_119 = arith.constant 0 : i32
      %104 = tpu.memref_slice %arg5[%9, %c0_i32_117, %c0_i32_118, %c0_i32_119] : memref<2x10x18x128xf32, #tpu.memory_space<vmem>> -> memref<1x10x18x128xf32, #tpu.memory_space<vmem>>
      %105 = tpu.memref_squeeze %104 : memref<1x10x18x128xf32, #tpu.memory_space<vmem>> -> memref<10x18x128xf32, #tpu.memory_space<vmem>>
      %106 = tpu.memref_slice %arg6[%9] : memref<2x!tpu.dma_semaphore, #tpu.memory_space<semaphore_mem>> -> memref<1x!tpu.dma_semaphore, #tpu.memory_space<semaphore_mem>>
      %107 = tpu.memref_squeeze %106 : memref<1x!tpu.dma_semaphore, #tpu.memory_space<semaphore_mem>> -> memref<!tpu.dma_semaphore, #tpu.memory_space<semaphore_mem>>
      tpu.enqueue_dma source(%103 : memref<10x18x128xf32, #tpu.memory_space<any>>) target(%105 : memref<10x18x128xf32, #tpu.memory_space<vmem>>) target_semaphore(%107 : memref<!tpu.dma_semaphore, #tpu.memory_space<semaphore_mem>>)
    } else {
    }
    %c1_i32_5 = arith.constant 1 : i32
    %13 = arith.addi %arg1, %c1_i32_5 : i32
    %c2_i32_6 = arith.constant 2 : i32
    %14 = arith.cmpi slt, %13, %c2_i32_6 : i32
    %15 = arith.extui %14 : i1 to i32
    %c0_i32_7 = arith.constant 0 : i32
    %16 = arith.cmpi ne, %15, %c0_i32_7 : i32
    scf.if %16 {
      %c1_i32_115 = arith.constant 1 : i32
      %100 = arith.addi %arg1, %c1_i32_115 : i32
      %c2_i32_116 = arith.constant 2 : i32
      %c0_i32_117 = arith.constant 0 : i32
      %101 = arith.cmpi eq, %c2_i32_116, %c0_i32_117 : i32
      %c1_i32_118 = arith.constant 1 : i32
      %102 = arith.select %101, %c1_i32_118, %c2_i32_116 : i32
      %103 = arith.remsi %100, %102 : i32
      %c0_i32_119 = arith.constant 0 : i32
      %104 = arith.cmpi ne, %103, %c0_i32_119 : i32
      %c0_i32_120 = arith.constant 0 : i32
      %105 = arith.cmpi slt, %103, %c0_i32_120 : i32
      %c0_i32_121 = arith.constant 0 : i32
      %106 = arith.cmpi slt, %102, %c0_i32_121 : i32
      %107 = arith.xori %105, %106 : i1
      %108 = arith.andi %107, %104 : i1
      %109 = arith.addi %103, %102 : i32
      %110 = arith.select %108, %109, %103 : i32
      %c1_i32_122 = arith.constant 1 : i32
      %111 = arith.addi %arg1, %c1_i32_122 : i32
      %c8_i32 = arith.constant 8 : i32
      %112 = arith.muli %111, %c8_i32 : i32
      %113 = tpu.assume_multiple %112, 8 : i32
      %c0_i32_123 = arith.constant 0 : i32
      %c0_i32_124 = arith.constant 0 : i32
      %114 = tpu.memref_slice %arg2[%arg0, %113, %c0_i32_123, %c0_i32_124] : memref<2x18x18x128xf32, #tpu.memory_space<any>> -> memref<1x10x18x128xf32, #tpu.memory_space<any>>
      %115 = tpu.memref_squeeze %114 : memref<1x10x18x128xf32, #tpu.memory_space<any>> -> memref<10x18x128xf32, #tpu.memory_space<any>>
      %c0_i32_125 = arith.constant 0 : i32
      %c0_i32_126 = arith.constant 0 : i32
      %c0_i32_127 = arith.constant 0 : i32
      %116 = tpu.memref_slice %arg5[%110, %c0_i32_125, %c0_i32_126, %c0_i32_127] : memref<2x10x18x128xf32, #tpu.memory_space<vmem>> -> memref<1x10x18x128xf32, #tpu.memory_space<vmem>>
      %117 = tpu.memref_squeeze %116 : memref<1x10x18x128xf32, #tpu.memory_space<vmem>> -> memref<10x18x128xf32, #tpu.memory_space<vmem>>
      %118 = tpu.memref_slice %arg6[%110] : memref<2x!tpu.dma_semaphore, #tpu.memory_space<semaphore_mem>> -> memref<1x!tpu.dma_semaphore, #tpu.memory_space<semaphore_mem>>
      %119 = tpu.memref_squeeze %118 : memref<1x!tpu.dma_semaphore, #tpu.memory_space<semaphore_mem>> -> memref<!tpu.dma_semaphore, #tpu.memory_space<semaphore_mem>>
      tpu.enqueue_dma source(%115 : memref<10x18x128xf32, #tpu.memory_space<any>>) target(%117 : memref<10x18x128xf32, #tpu.memory_space<vmem>>) target_semaphore(%119 : memref<!tpu.dma_semaphore, #tpu.memory_space<semaphore_mem>>)
    } else {
    }
    %c0_i32_8 = arith.constant 0 : i32
    %c0_i32_9 = arith.constant 0 : i32
    %c0_i32_10 = arith.constant 0 : i32
    %17 = tpu.memref_slice %arg2[%arg0, %c0_i32_8, %c0_i32_9, %c0_i32_10] : memref<2x18x18x128xf32, #tpu.memory_space<any>> -> memref<1x10x18x128xf32, #tpu.memory_space<any>>
    %18 = tpu.memref_squeeze %17 : memref<1x10x18x128xf32, #tpu.memory_space<any>> -> memref<10x18x128xf32, #tpu.memory_space<any>>
    %c0_i32_11 = arith.constant 0 : i32
    %c0_i32_12 = arith.constant 0 : i32
    %c0_i32_13 = arith.constant 0 : i32
    %19 = tpu.memref_slice %arg5[%9, %c0_i32_11, %c0_i32_12, %c0_i32_13] : memref<2x10x18x128xf32, #tpu.memory_space<vmem>> -> memref<1x10x18x128xf32, #tpu.memory_space<vmem>>
    %20 = tpu.memref_squeeze %19 : memref<1x10x18x128xf32, #tpu.memory_space<vmem>> -> memref<10x18x128xf32, #tpu.memory_space<vmem>>
    %21 = tpu.memref_slice %arg6[%9] : memref<2x!tpu.dma_semaphore, #tpu.memory_space<semaphore_mem>> -> memref<1x!tpu.dma_semaphore, #tpu.memory_space<semaphore_mem>>
    %22 = tpu.memref_squeeze %21 : memref<1x!tpu.dma_semaphore, #tpu.memory_space<semaphore_mem>> -> memref<!tpu.dma_semaphore, #tpu.memory_space<semaphore_mem>>
    tpu.wait_dma2 semaphore(%22 : memref<!tpu.dma_semaphore, #tpu.memory_space<semaphore_mem>>) src(%18 : memref<10x18x128xf32, #tpu.memory_space<any>>) dst(%20 : memref<10x18x128xf32, #tpu.memory_space<vmem>>)
    %cst = arith.constant 0.000000e+00 : f32
    %23 = vector.broadcast %cst : f32 to vector<128x128xf32>
    %c0_i32_14 = arith.constant 0 : i32
    %c0_i32_15 = arith.constant 0 : i32
    %c0_i32_16 = arith.constant 0 : i32
    %24 = tpu.memref_slice %arg5[%9, %c0_i32_14, %c0_i32_15, %c0_i32_16] : memref<2x10x18x128xf32, #tpu.memory_space<vmem>> -> memref<1x10x18x128xf32, #tpu.memory_space<vmem>>
    %25 = tpu.memref_squeeze %24 : memref<1x10x18x128xf32, #tpu.memory_space<vmem>> -> memref<10x18x128xf32, #tpu.memory_space<vmem>>
    %c0 = arith.constant 0 : index
    %c0_17 = arith.constant 0 : index
    %c0_18 = arith.constant 0 : index
    %26 = vector.load %25[%c0, %c0_17, %c0_18] : memref<10x18x128xf32, #tpu.memory_space<vmem>>, vector<8x16x128xf32>
    %27 = vector.shape_cast %26 : vector<8x16x128xf32> to vector<128x128xf32>
    %c0_19 = arith.constant 0 : index
    %c0_20 = arith.constant 0 : index
    %c0_21 = arith.constant 0 : index
    %c0_22 = arith.constant 0 : index
    %28 = vector.load %arg3[%c0_19, %c0_20, %c0_21, %c0_22] : memref<3x3x128x128xf32, #tpu.memory_space<vmem>>, vector<1x1x128x128xf32>
    %29 = vector.shape_cast %28 : vector<1x1x128x128xf32> to vector<128x128xf32>
    %cst_23 = arith.constant dense<0.000000e+00> : vector<128x128xf32>
    %30 = tpu.matmul %27, %29, %cst_23 {dimension_numbers = #tpu.dot_dimension_numbers<[1], [0], [0], [1], [0, 0, 1, 1], [], []>} : vector<128x128xf32>, vector<128x128xf32>, vector<128x128xf32> -> vector<128x128xf32>
    %31 = arith.addf %23, %30 : vector<128x128xf32>
    %c0_i32_24 = arith.constant 0 : i32
    %c0_i32_25 = arith.constant 0 : i32
    %c0_i32_26 = arith.constant 0 : i32
    %32 = tpu.memref_slice %arg5[%9, %c0_i32_24, %c0_i32_25, %c0_i32_26] : memref<2x10x18x128xf32, #tpu.memory_space<vmem>> -> memref<1x10x18x128xf32, #tpu.memory_space<vmem>>
    %33 = tpu.memref_squeeze %32 : memref<1x10x18x128xf32, #tpu.memory_space<vmem>> -> memref<10x18x128xf32, #tpu.memory_space<vmem>>
    %c0_27 = arith.constant 0 : index
    %c1 = arith.constant 1 : index
    %c0_28 = arith.constant 0 : index
    %34 = vector.load %33[%c0_27, %c1, %c0_28] : memref<10x18x128xf32, #tpu.memory_space<vmem>>, vector<8x16x128xf32>
    %35 = vector.shape_cast %34 : vector<8x16x128xf32> to vector<128x128xf32>
    %c0_29 = arith.constant 0 : index
    %c1_30 = arith.constant 1 : index
    %c0_31 = arith.constant 0 : index
    %c0_32 = arith.constant 0 : index
    %36 = vector.load %arg3[%c0_29, %c1_30, %c0_31, %c0_32] : memref<3x3x128x128xf32, #tpu.memory_space<vmem>>, vector<1x1x128x128xf32>
    %37 = vector.shape_cast %36 : vector<1x1x128x128xf32> to vector<128x128xf32>
    %cst_33 = arith.constant dense<0.000000e+00> : vector<128x128xf32>
    %38 = tpu.matmul %35, %37, %cst_33 {dimension_numbers = #tpu.dot_dimension_numbers<[1], [0], [0], [1], [0, 0, 1, 1], [], []>} : vector<128x128xf32>, vector<128x128xf32>, vector<128x128xf32> -> vector<128x128xf32>
    %39 = arith.addf %31, %38 : vector<128x128xf32>
    %c0_i32_34 = arith.constant 0 : i32
    %c0_i32_35 = arith.constant 0 : i32
    %c0_i32_36 = arith.constant 0 : i32
    %40 = tpu.memref_slice %arg5[%9, %c0_i32_34, %c0_i32_35, %c0_i32_36] : memref<2x10x18x128xf32, #tpu.memory_space<vmem>> -> memref<1x10x18x128xf32, #tpu.memory_space<vmem>>
    %41 = tpu.memref_squeeze %40 : memref<1x10x18x128xf32, #tpu.memory_space<vmem>> -> memref<10x18x128xf32, #tpu.memory_space<vmem>>
    %c0_37 = arith.constant 0 : index
    %c2 = arith.constant 2 : index
    %c0_38 = arith.constant 0 : index
    %42 = vector.load %41[%c0_37, %c2, %c0_38] : memref<10x18x128xf32, #tpu.memory_space<vmem>>, vector<8x16x128xf32>
    %43 = vector.shape_cast %42 : vector<8x16x128xf32> to vector<128x128xf32>
    %c0_39 = arith.constant 0 : index
    %c2_40 = arith.constant 2 : index
    %c0_41 = arith.constant 0 : index
    %c0_42 = arith.constant 0 : index
    %44 = vector.load %arg3[%c0_39, %c2_40, %c0_41, %c0_42] : memref<3x3x128x128xf32, #tpu.memory_space<vmem>>, vector<1x1x128x128xf32>
    %45 = vector.shape_cast %44 : vector<1x1x128x128xf32> to vector<128x128xf32>
    %cst_43 = arith.constant dense<0.000000e+00> : vector<128x128xf32>
    %46 = tpu.matmul %43, %45, %cst_43 {dimension_numbers = #tpu.dot_dimension_numbers<[1], [0], [0], [1], [0, 0, 1, 1], [], []>} : vector<128x128xf32>, vector<128x128xf32>, vector<128x128xf32> -> vector<128x128xf32>
    %47 = arith.addf %39, %46 : vector<128x128xf32>
    %c0_i32_44 = arith.constant 0 : i32
    %c0_i32_45 = arith.constant 0 : i32
    %c0_i32_46 = arith.constant 0 : i32
    %48 = tpu.memref_slice %arg5[%9, %c0_i32_44, %c0_i32_45, %c0_i32_46] : memref<2x10x18x128xf32, #tpu.memory_space<vmem>> -> memref<1x10x18x128xf32, #tpu.memory_space<vmem>>
    %49 = tpu.memref_squeeze %48 : memref<1x10x18x128xf32, #tpu.memory_space<vmem>> -> memref<10x18x128xf32, #tpu.memory_space<vmem>>
    %c1_47 = arith.constant 1 : index
    %c0_48 = arith.constant 0 : index
    %c0_49 = arith.constant 0 : index
    %50 = vector.load %49[%c1_47, %c0_48, %c0_49] : memref<10x18x128xf32, #tpu.memory_space<vmem>>, vector<8x16x128xf32>
    %51 = vector.shape_cast %50 : vector<8x16x128xf32> to vector<128x128xf32>
    %c1_50 = arith.constant 1 : index
    %c0_51 = arith.constant 0 : index
    %c0_52 = arith.constant 0 : index
    %c0_53 = arith.constant 0 : index
    %52 = vector.load %arg3[%c1_50, %c0_51, %c0_52, %c0_53] : memref<3x3x128x128xf32, #tpu.memory_space<vmem>>, vector<1x1x128x128xf32>
    %53 = vector.shape_cast %52 : vector<1x1x128x128xf32> to vector<128x128xf32>
    %cst_54 = arith.constant dense<0.000000e+00> : vector<128x128xf32>
    %54 = tpu.matmul %51, %53, %cst_54 {dimension_numbers = #tpu.dot_dimension_numbers<[1], [0], [0], [1], [0, 0, 1, 1], [], []>} : vector<128x128xf32>, vector<128x128xf32>, vector<128x128xf32> -> vector<128x128xf32>
    %55 = arith.addf %47, %54 : vector<128x128xf32>
    %c0_i32_55 = arith.constant 0 : i32
    %c0_i32_56 = arith.constant 0 : i32
    %c0_i32_57 = arith.constant 0 : i32
    %56 = tpu.memref_slice %arg5[%9, %c0_i32_55, %c0_i32_56, %c0_i32_57] : memref<2x10x18x128xf32, #tpu.memory_space<vmem>> -> memref<1x10x18x128xf32, #tpu.memory_space<vmem>>
    %57 = tpu.memref_squeeze %56 : memref<1x10x18x128xf32, #tpu.memory_space<vmem>> -> memref<10x18x128xf32, #tpu.memory_space<vmem>>
    %c1_58 = arith.constant 1 : index
    %c1_59 = arith.constant 1 : index
    %c0_60 = arith.constant 0 : index
    %58 = vector.load %57[%c1_58, %c1_59, %c0_60] : memref<10x18x128xf32, #tpu.memory_space<vmem>>, vector<8x16x128xf32>
    %59 = vector.shape_cast %58 : vector<8x16x128xf32> to vector<128x128xf32>
    %c1_61 = arith.constant 1 : index
    %c1_62 = arith.constant 1 : index
    %c0_63 = arith.constant 0 : index
    %c0_64 = arith.constant 0 : index
    %60 = vector.load %arg3[%c1_61, %c1_62, %c0_63, %c0_64] : memref<3x3x128x128xf32, #tpu.memory_space<vmem>>, vector<1x1x128x128xf32>
    %61 = vector.shape_cast %60 : vector<1x1x128x128xf32> to vector<128x128xf32>
    %cst_65 = arith.constant dense<0.000000e+00> : vector<128x128xf32>
    %62 = tpu.matmul %59, %61, %cst_65 {dimension_numbers = #tpu.dot_dimension_numbers<[1], [0], [0], [1], [0, 0, 1, 1], [], []>} : vector<128x128xf32>, vector<128x128xf32>, vector<128x128xf32> -> vector<128x128xf32>
    %63 = arith.addf %55, %62 : vector<128x128xf32>
    %c0_i32_66 = arith.constant 0 : i32
    %c0_i32_67 = arith.constant 0 : i32
    %c0_i32_68 = arith.constant 0 : i32
    %64 = tpu.memref_slice %arg5[%9, %c0_i32_66, %c0_i32_67, %c0_i32_68] : memref<2x10x18x128xf32, #tpu.memory_space<vmem>> -> memref<1x10x18x128xf32, #tpu.memory_space<vmem>>
    %65 = tpu.memref_squeeze %64 : memref<1x10x18x128xf32, #tpu.memory_space<vmem>> -> memref<10x18x128xf32, #tpu.memory_space<vmem>>
    %c1_69 = arith.constant 1 : index
    %c2_70 = arith.constant 2 : index
    %c0_71 = arith.constant 0 : index
    %66 = vector.load %65[%c1_69, %c2_70, %c0_71] : memref<10x18x128xf32, #tpu.memory_space<vmem>>, vector<8x16x128xf32>
    %67 = vector.shape_cast %66 : vector<8x16x128xf32> to vector<128x128xf32>
    %c1_72 = arith.constant 1 : index
    %c2_73 = arith.constant 2 : index
    %c0_74 = arith.constant 0 : index
    %c0_75 = arith.constant 0 : index
    %68 = vector.load %arg3[%c1_72, %c2_73, %c0_74, %c0_75] : memref<3x3x128x128xf32, #tpu.memory_space<vmem>>, vector<1x1x128x128xf32>
    %69 = vector.shape_cast %68 : vector<1x1x128x128xf32> to vector<128x128xf32>
    %cst_76 = arith.constant dense<0.000000e+00> : vector<128x128xf32>
    %70 = tpu.matmul %67, %69, %cst_76 {dimension_numbers = #tpu.dot_dimension_numbers<[1], [0], [0], [1], [0, 0, 1, 1], [], []>} : vector<128x128xf32>, vector<128x128xf32>, vector<128x128xf32> -> vector<128x128xf32>
    %71 = arith.addf %63, %70 : vector<128x128xf32>
    %c0_i32_77 = arith.constant 0 : i32
    %c0_i32_78 = arith.constant 0 : i32
    %c0_i32_79 = arith.constant 0 : i32
    %72 = tpu.memref_slice %arg5[%9, %c0_i32_77, %c0_i32_78, %c0_i32_79] : memref<2x10x18x128xf32, #tpu.memory_space<vmem>> -> memref<1x10x18x128xf32, #tpu.memory_space<vmem>>
    %73 = tpu.memref_squeeze %72 : memref<1x10x18x128xf32, #tpu.memory_space<vmem>> -> memref<10x18x128xf32, #tpu.memory_space<vmem>>
    %c2_80 = arith.constant 2 : index
    %c0_81 = arith.constant 0 : index
    %c0_82 = arith.constant 0 : index
    %74 = vector.load %73[%c2_80, %c0_81, %c0_82] : memref<10x18x128xf32, #tpu.memory_space<vmem>>, vector<8x16x128xf32>
    %75 = vector.shape_cast %74 : vector<8x16x128xf32> to vector<128x128xf32>
    %c2_83 = arith.constant 2 : index
    %c0_84 = arith.constant 0 : index
    %c0_85 = arith.constant 0 : index
    %c0_86 = arith.constant 0 : index
    %76 = vector.load %arg3[%c2_83, %c0_84, %c0_85, %c0_86] : memref<3x3x128x128xf32, #tpu.memory_space<vmem>>, vector<1x1x128x128xf32>
    %77 = vector.shape_cast %76 : vector<1x1x128x128xf32> to vector<128x128xf32>
    %cst_87 = arith.constant dense<0.000000e+00> : vector<128x128xf32>
    %78 = tpu.matmul %75, %77, %cst_87 {dimension_numbers = #tpu.dot_dimension_numbers<[1], [0], [0], [1], [0, 0, 1, 1], [], []>} : vector<128x128xf32>, vector<128x128xf32>, vector<128x128xf32> -> vector<128x128xf32>
    %79 = arith.addf %71, %78 : vector<128x128xf32>
    %c0_i32_88 = arith.constant 0 : i32
    %c0_i32_89 = arith.constant 0 : i32
    %c0_i32_90 = arith.constant 0 : i32
    %80 = tpu.memref_slice %arg5[%9, %c0_i32_88, %c0_i32_89, %c0_i32_90] : memref<2x10x18x128xf32, #tpu.memory_space<vmem>> -> memref<1x10x18x128xf32, #tpu.memory_space<vmem>>
    %81 = tpu.memref_squeeze %80 : memref<1x10x18x128xf32, #tpu.memory_space<vmem>> -> memref<10x18x128xf32, #tpu.memory_space<vmem>>
    %c2_91 = arith.constant 2 : index
    %c1_92 = arith.constant 1 : index
    %c0_93 = arith.constant 0 : index
    %82 = vector.load %81[%c2_91, %c1_92, %c0_93] : memref<10x18x128xf32, #tpu.memory_space<vmem>>, vector<8x16x128xf32>
    %83 = vector.shape_cast %82 : vector<8x16x128xf32> to vector<128x128xf32>
    %c2_94 = arith.constant 2 : index
    %c1_95 = arith.constant 1 : index
    %c0_96 = arith.constant 0 : index
    %c0_97 = arith.constant 0 : index
    %84 = vector.load %arg3[%c2_94, %c1_95, %c0_96, %c0_97] : memref<3x3x128x128xf32, #tpu.memory_space<vmem>>, vector<1x1x128x128xf32>
    %85 = vector.shape_cast %84 : vector<1x1x128x128xf32> to vector<128x128xf32>
    %cst_98 = arith.constant dense<0.000000e+00> : vector<128x128xf32>
    %86 = tpu.matmul %83, %85, %cst_98 {dimension_numbers = #tpu.dot_dimension_numbers<[1], [0], [0], [1], [0, 0, 1, 1], [], []>} : vector<128x128xf32>, vector<128x128xf32>, vector<128x128xf32> -> vector<128x128xf32>
    %87 = arith.addf %79, %86 : vector<128x128xf32>
    %c0_i32_99 = arith.constant 0 : i32
    %c0_i32_100 = arith.constant 0 : i32
    %c0_i32_101 = arith.constant 0 : i32
    %88 = tpu.memref_slice %arg5[%9, %c0_i32_99, %c0_i32_100, %c0_i32_101] : memref<2x10x18x128xf32, #tpu.memory_space<vmem>> -> memref<1x10x18x128xf32, #tpu.memory_space<vmem>>
    %89 = tpu.memref_squeeze %88 : memref<1x10x18x128xf32, #tpu.memory_space<vmem>> -> memref<10x18x128xf32, #tpu.memory_space<vmem>>
    %c2_102 = arith.constant 2 : index
    %c2_103 = arith.constant 2 : index
    %c0_104 = arith.constant 0 : index
    %90 = vector.load %89[%c2_102, %c2_103, %c0_104] : memref<10x18x128xf32, #tpu.memory_space<vmem>>, vector<8x16x128xf32>
    %91 = vector.shape_cast %90 : vector<8x16x128xf32> to vector<128x128xf32>
    %c2_105 = arith.constant 2 : index
    %c2_106 = arith.constant 2 : index
    %c0_107 = arith.constant 0 : index
    %c0_108 = arith.constant 0 : index
    %92 = vector.load %arg3[%c2_105, %c2_106, %c0_107, %c0_108] : memref<3x3x128x128xf32, #tpu.memory_space<vmem>>, vector<1x1x128x128xf32>
    %93 = vector.shape_cast %92 : vector<1x1x128x128xf32> to vector<128x128xf32>
    %cst_109 = arith.constant dense<0.000000e+00> : vector<128x128xf32>
    %94 = tpu.matmul %91, %93, %cst_109 {dimension_numbers = #tpu.dot_dimension_numbers<[1], [0], [0], [1], [0, 0, 1, 1], [], []>} : vector<128x128xf32>, vector<128x128xf32>, vector<128x128xf32> -> vector<128x128xf32>
    %95 = arith.addf %87, %94 : vector<128x128xf32>
    %cst_110 = arith.constant 0.000000e+00 : f32
    %96 = vector.broadcast %cst_110 : f32 to vector<128x128xf32>
    %97 = arith.maximumf %95, %96 : vector<128x128xf32>
    %98 = vector.shape_cast %97 : vector<128x128xf32> to vector<1x8x16x128xf32>
    %c0_111 = arith.constant 0 : index
    %c0_112 = arith.constant 0 : index
    %c0_113 = arith.constant 0 : index
    %c0_114 = arith.constant 0 : index
    %99 = vector.load %arg4[%c0_111, %c0_112, %c0_113, %c0_114] : memref<1x8x16x128xf32, #tpu.memory_space<vmem>>, vector<1x8x16x128xf32>
    tpu.vector_store %arg4[%c0_111, %c0_112, %c0_113, %c0_114], %98 {strides = array<i32>} : memref<1x8x16x128xf32, #tpu.memory_space<vmem>>, vector<1x8x16x128xf32>,
    return
  }
  func.func @transform_1(%arg0: i32, %arg1: i32) -> (i32, i32, i32, i32) {
    %c0_i32 = arith.constant 0 : i32
    %c0_i32_0 = arith.constant 0 : i32
    %c0_i32_1 = arith.constant 0 : i32
    %c0_i32_2 = arith.constant 0 : i32
    %c0_i32_3 = arith.constant 0 : i32
    return %c0_i32, %c0_i32_0, %c0_i32_1, %c0_i32_2 : i32, i32, i32, i32
  }
  func.func @transform_2(%arg0: i32, %arg1: i32) -> (i32, i32, i32, i32) {
    %c0_i32 = arith.constant 0 : i32
    %c0_i32_0 = arith.constant 0 : i32
    %c0_i32_1 = arith.constant 0 : i32
    return %arg0, %arg1, %c0_i32, %c0_i32_0 : i32, i32, i32, i32
  }
}

</mosaic_0001>

<bundles_post_ra>
// kernel: vdsr_layer_lite.1
= control target key start
LH: loop header
LB: loop body
LE: loop exit
PB: predicated region body
PF: predicated region fallthrough
CT: control target
= control target key end

     0   :  { %s3958_s9 = smov 0   ;;  %s3960_s10 = smov 0   ;;  %s4914_s0 = inlined_call_operand.vmem [shape: f32[2,18,18,128], index: 0, kind: input, shape index: {}]   ;;  %s4915_s1 = inlined_call_operand.vmem [shape: f32[3,3,128,128], index: 1, kind: input, shape index: {}]   ;;  %s4916_s2 = inlined_call_operand.vmem [shape: f32[2,16,16,128], index: 2, kind: output, shape index: {}]  }
   0x1   :  { %s3962_s11 = smov 0   ;;  %s3964_s12 = smov 0  }
   0x2   :  { %s3966_s13 = smov 0  }
   0x3 LB: > { %s21_s14 = sadd.s32 1, %s3933_s11  ;;  %s24_s15 = sadd.s32 1, %s3937_s12  ;;  %s3941_s13 = sphi %s3966_s13, %s12_s13   ;;  %s3937_s12 = sphi %s3964_s12, %s4920_s12   ;;  %s3933_s11 = sphi %s3962_s11, %s4919_s11   ;;  %s3929_s10 = sphi %s3960_s10, %s4918_s10   ;;  %s3925_s9 = sphi %s3958_s9, %s4917_s9  }
   0x4   : > { %p22_p0 = scmp.ge.s32.totalorder %s21_s14, 2  ;;  %p2323_p1 = scmp.ge.s32.totalorder %s3941_s13, 1 }
   0x5   : > { %p92_p2 = scmp.lt.s32.totalorder %s3941_s13, 5 }
   0x6   : > { %s4922_s14 = smov (%p22_p0, %s21_s14), 0  ;;  %s4924_s15 = smov (!%p22_p0, %s24_s15), %s3937_s12 }
   0x7   : > { %p93_p3 = pnand %p2323_p1, %p92_p2  ;;  %p26_p4 = scmp.ge.s32.totalorder %s4924_s15, 2 }
   0x8   : > { %s2324_s16 = sshll.u32 (!%p93_p3), %s3925_s9, 3  ;;  %p113_p5 = scmp.lt.s32.totalorder (!%p93_p3), %s3929_s10, 1 }
   0x9   : > { %s4926_s15 = smov (%p26_p4, %s4924_s15), 0  ;;  %96 = sbr.rel (%p93_p3) target bundleno = 477 (0x1dd), region = 24 }
   0xa   : > { %p115_p6 = scmp.lt.s32.totalorder (!%p93_p3), %s2324_s16, 15  ;;  %p123_p7 = scmp.lt.s32.totalorder (!%p93_p3), %s3925_s9, 0 }
   0xb   : > { %s124_s19 = ssub.s32 (!%p93_p3), 0, %s3925_s9  ;;  %p2331_p9 = scmp.ne.s32.totalorder (!%p93_p3), %s3925_s9, 0 }
   0xc   : > { %s2328_s21 = smin.u32 (!%p93_p3), %s3925_s9, %s124_s19 }
   0xd   : > { %s126_s23 = sand.u32 (!%p93_p3), 1, %s2328_s21  }
   0xe   : > { %s127_s25 = ssub.s32 (!%p93_p3), 0, %s126_s23 }
  0x10   : > { %s114_s17 = scalar_select %p113_p5, %s3929_s10, 1 }
  0x11   : > { %s4928_s16 = smov (!%p115_p6, %s2324_s16), 15  ;;  %s4930_s25 = smov (!%p123_p7, %s127_s25), %s126_s23 }
  0x12   : > { %s2326_s18 = sshll.u32 %s114_s17, 5  ;;  %s2325_s20 = sshll.u32 %s4928_s16, 1 }
  0x13   : > { %s119_s22 = sadd.s32 %s2326_s18, %s2325_s20  ;;  %p2330_p8 = scmp.lt.s32.totalorder %s4930_s25, 0 }
  0x14   : > { %s2327_s24 = sshll.u32 %s119_s22, 3  ;;  %s133_s29 = sadd.s32 2, %s4930_s25 }
  0x15   : > { %s4001_s28 = scalar_lea.vmem %s4916_s2, %s2327_s24  ;;  %s4932_s29 = smov (!%p2330_p8, %s133_s29), %s4930_s25 }
  0x16   : > { %138 = sbr.rel (%p2331_p9) target bundleno = 46 (0x2e), region = 28  ;;  %s146_s17 = scalar_lea.sflag (!%p2331_p9), [#allocation3], %s4932_s29 }
  0x17   : > { %s2333_s30 = smul.u32 (!%p2331_p9), 192, %s3925_s9 }
  0x18   : > { %s141_s3 = smul.u32 (!%p2331_p9), 432, %s3929_s10 }
  0x19   : > { %s144_s4 = smul.u32 (!%p2331_p9), 240, %s4932_s29 }
  0x1a   : > { %s142_s5 = sadd.s32 (!%p2331_p9), %s2333_s30, %s141_s3 }
  0x1b   : > { %s4012_s8 = scalar_lea.vmem (!%p2331_p9), %s4914_s0, %s142_s5  ;;  %s4017_s16 = scalar_lea.vmem (!%p2331_p9), [#allocation2], %s144_s4 }
  0x1c   : > { %v202_v0 = vld [vmem:[%s4012_s8] sm:$0xff] (!%p2331_p9)  ;;  %v204_v1 = vld [vmem:[%s4012_s8 + $0x8] sm:$0xff] (!%p2331_p9)  ;;  %v206_v2 = vld [vmem:[%s4012_s8 + $0x18] sm:$0xff] (!%p2331_p9) }
  0x1d   : > { %203 = vst [vmem:[%s4017_s16] sm:$0xff] %v202_v0  ;;  %205 = vst [vmem:[%s4017_s16 + $0x8] sm:$0xff] %v204_v1  ;;  %v208_v3 = vld [vmem:[%s4012_s8 + $0x20] sm:$0xff]  ;;  %v210_v4 = vld [vmem:[%s4012_s8 + $0x30] sm:$0xff] }
  0x1e   : > { %207 = vst [vmem:[%s4017_s16 + $0x18] sm:$0xff] %v206_v2  ;;  %v212_v5 = vld [vmem:[%s4012_s8 + $0x38] sm:$0xff]  ;;  %209 = vst [vmem:[%s4017_s16 + $0x20] sm:$0xff] %v208_v3  ;;  %v214_v6 = vld [vmem:[%s4012_s8 + $0x48] sm:$0xff] }
  0x1f   : > { %211 = vst [vmem:[%s4017_s16 + $0x30] sm:$0xff] %v210_v4  ;;  %213 = vst [vmem:[%s4017_s16 + $0x38] sm:$0xff] %v212_v5  ;;  %v216_v7 = vld [vmem:[%s4012_s8 + $0x50] sm:$0xff]  ;;  %v218_v8 = vld [vmem:[%s4012_s8 + $0x60] sm:$0xff] }
  0x20   : > { %215 = vst [vmem:[%s4017_s16 + $0x48] sm:$0xff] %v214_v6  ;;  %217 = vst [vmem:[%s4017_s16 + $0x50] sm:$0xff] %v216_v7  ;;  %v220_v9 = vld [vmem:[%s4012_s8 + $0x68] sm:$0xff]  ;;  %v222_v10 = vld [vmem:[%s4012_s8 + $0x78] sm:$0xff] }
  0x21   : > { %219 = vst [vmem:[%s4017_s16 + $0x60] sm:$0xff] %v218_v8  ;;  %v224_v11 = vld [vmem:[%s4012_s8 + $0x80] sm:$0xff]  ;;  %221 = vst [vmem:[%s4017_s16 + $0x68] sm:$0xff] %v220_v9  ;;  %v226_v12 = vld [vmem:[%s4012_s8 + $0x90] sm:$0xff] }
  0x22   : > { %223 = vst [vmem:[%s4017_s16 + $0x78] sm:$0xff] %v222_v10  ;;  %225 = vst [vmem:[%s4017_s16 + $0x80] sm:$0xff] %v224_v11  ;;  %v228_v13 = vld [vmem:[%s4012_s8 + $0x98] sm:$0xff]  ;;  %v230_v14 = vld [vmem:[%s4012_s8 + $0xa8] sm:$0xff] }
  0x23   : > { %227 = vst [vmem:[%s4017_s16 + $0x90] sm:$0xff] %v226_v12  ;;  %229 = vst [vmem:[%s4017_s16 + $0x98] sm:$0xff] %v228_v13  ;;  %v232_v15 = vld [vmem:[%s4012_s8 + $0xb0] sm:$0xff]  ;;  %v234_v16 = vld [vmem:[%s4012_s8 + $0xc0] sm:$0xff] }
  0x24   : > { %231 = vst [vmem:[%s4017_s16 + $0xa8] sm:$0xff] %v230_v14  ;;  %v236_v17 = vld [vmem:[%s4012_s8 + $0xc8] sm:$0xff]  ;;  %233 = vst [vmem:[%s4017_s16 + $0xb0] sm:$0xff] %v232_v15  ;;  %v238_v18 = vld [vmem:[%s4012_s8 + $0xd8] sm:$0xff] }
  0x25   : > { %235 = vst [vmem:[%s4017_s16 + $0xc0] sm:$0xff] %v234_v16  ;;  %237 = vst [vmem:[%s4017_s16 + $0xc8] sm:$0xff] %v236_v17  ;;  %v240_v19 = vld [vmem:[%s4012_s8 + $0xe0] sm:$0xff]  ;;  %v2334_v20 = vld [vmem:[%s4012_s8 + $0x10] sm:$0x3] }
  0x26   : > { %239 = vst [vmem:[%s4017_s16 + $0xd8] sm:$0xff] %v238_v18  ;;  %241 = vst [vmem:[%s4017_s16 + $0xe0] sm:$0xff] %v240_v19  ;;  %v2336_v21 = vld [vmem:[%s4012_s8 + $0x28] sm:$0x3]  ;;  %v2338_v22 = vld [vmem:[%s4012_s8 + $0x40] sm:$0x3] }
  0x27   : > { %2335 = vst [vmem:[%s4017_s16 + $0x10] sm:$0x3] %v2334_v20  ;;  %v2340_v23 = vld [vmem:[%s4012_s8 + $0x58] sm:$0x3]  ;;  %2337 = vst [vmem:[%s4017_s16 + $0x28] sm:$0x3] %v2336_v21 }
  0x28   : > { %2339 = vst [vmem:[%s4017_s16 + $0x40] sm:$0x3] %v2338_v22  ;;  %2341 = vst [vmem:[%s4017_s16 + $0x58] sm:$0x3] %v2340_v23  ;;  %v2342_v24 = vld [vmem:[%s4012_s8 + $0x70] sm:$0x3] }
  0x29   : > { %v2344_v25 = vld [vmem:[%s4012_s8 + $0x88] sm:$0x3]  ;;  %v2346_v26 = vld [vmem:[%s4012_s8 + $0xa0] sm:$0x3]  ;;  %2343 = vst [vmem:[%s4017_s16 + $0x70] sm:$0x3] %v2342_v24 }
  0x2a   : > { %2345 = vst [vmem:[%s4017_s16 + $0x88] sm:$0x3] %v2344_v25  ;;  %2347 = vst [vmem:[%s4017_s16 + $0xa0] sm:$0x3] %v2346_v26  ;;  %v2348_v27 = vld [vmem:[%s4012_s8 + $0xb8] sm:$0x3] }
  0x2b   : > { %v2350_v28 = vld [vmem:[%s4012_s8 + $0xd0] sm:$0x3]  ;;  %v2352_v29 = vld [vmem:[%s4012_s8 + $0xe8] sm:$0x3]  ;;  %2349 = vst [vmem:[%s4017_s16 + $0xb8] sm:$0x3] %v2348_v27 }
  0x2c   : > { %2351 = vst [vmem:[%s4017_s16 + $0xd0] sm:$0x3] %v2350_v28  ;;  %2353 = vst [vmem:[%s4017_s16 + $0xe8] sm:$0x3] %v2352_v29 }
  0x2d   : > { %274 = vsyncadd %s146_s17, 2880 }
  0x2e PF: > { %s275_s18 = sadd.s32 1, %s3925_s9 }
  0x2f   : > { %p2354_p10 = scmp.ge.s32.totalorder %s275_s18, 2 }
  0x30   : > { %p280_p11 = scmp.lt.s32.totalorder (!%p2354_p10), %s275_s18, 0  ;;  %s281_s19 = ssub.s32 (!%p2354_p10), 0, %s275_s18 }
  0x31   : > { %279 = sbr.rel (%p2354_p10) target bundleno = 79 (0x4f), region = 69  ;;  %s2355_s20 = smin.u32 (!%p2354_p10), %s281_s19, %s275_s18 }
  0x32   : > { %s2246_s21 = smul.u32 (!%p2354_p10), 192, %s3925_s9  ;;  %s283_s22 = sand.u32 (!%p2354_p10), 1, %s2355_s20  }
  0x33   : > { %s2247_s23 = smul.u32 (!%p2354_p10), 432, %s3929_s10  ;;  %s284_s24 = ssub.s32 (!%p2354_p10), 0, %s283_s22 }
  0x35   : > { %s2248_s25 = sadd.s32 (!%p2354_p10), %s2247_s23, %s2246_s21 }
  0x36   : > { %s4083_s3 = scalar_lea.vmem (!%p2354_p10), %s4914_s0, %s2248_s25 }
  0x37   : > { %v2359_v30 = vld [vmem:[%s4083_s3 + $0xc0] sm:$0xff] (!%p2354_p10)  ;;  %v2360_v31 = vld [vmem:[%s4083_s3 + $0xc8] sm:$0xff] (!%p2354_p10)  ;;  %v2361_v32 = vld [vmem:[%s4083_s3 + $0xd8] sm:$0xff] (!%p2354_p10) }
  0x38   : > { %s4934_s24 = smov (!%p280_p11, %s284_s24), %s283_s22  ;;  %v2362_v33 = vld [vmem:[%s4083_s3 + $0xe0] sm:$0xff]  ;;  %v2363_v34 = vld [vmem:[%s4083_s3 + $0xf0] sm:$0xff]  ;;  %v2364_v35 = vld [vmem:[%s4083_s3 + $0xf8] sm:$0xff] }
  0x39   : > { %p2357_p12 = scmp.lt.s32.totalorder %s4934_s24, 0  ;;  %s290_s26 = sadd.s32 2, %s4934_s24  ;;  %v2365_v36 = vld [vmem:[%s4083_s3 + $0x108] sm:$0xff]  ;;  %v2366_v37 = vld [vmem:[%s4083_s3 + $0x110] sm:$0xff]  ;;  %v2367_v38 = vld [vmem:[%s4083_s3 + $0x120] sm:$0xff] }
  0x3a   : > { %v2368_v39 = vld [vmem:[%s4083_s3 + $0x128] sm:$0xff]  ;;  %v2369_v40 = vld [vmem:[%s4083_s3 + $0x138] sm:$0xff]  ;;  %v2370_v41 = vld [vmem:[%s4083_s3 + $0x140] sm:$0xff] }
  0x3b   : > { %s4936_s26 = smov (!%p2357_p12, %s290_s26), %s4934_s24  ;;  %v2371_v42 = vld [vmem:[%s4083_s3 + $0x150] sm:$0xff]  ;;  %v2372_v43 = vld [vmem:[%s4083_s3 + $0x158] sm:$0xff]  ;;  %v2373_v44 = vld [vmem:[%s4083_s3 + $0x168] sm:$0xff] }
  0x3c   : > { %s297_s9 = smul.u32 240, %s4936_s26  ;;  %v2374_v45 = vld [vmem:[%s4083_s3 + $0x170] sm:$0xff]  ;;  %v2375_v46 = vld [vmem:[%s4083_s3 + $0x180] sm:$0xff]  ;;  %v2376_v47 = vld [vmem:[%s4083_s3 + $0x188] sm:$0xff]  ;;  %s299_s4 = scalar_lea.sflag [#allocation3], %s4936_s26 }
  0x3d   : > { %v2377_v48 = vld [vmem:[%s4083_s3 + $0x198] sm:$0xff]  ;;  %v2378_v49 = vld [vmem:[%s4083_s3 + $0x1a0] sm:$0xff]  ;;  %v2379_v50 = vld [vmem:[%s4083_s3 + $0xd0] sm:$0x3] }
  0x3e   : > { %s4103_s10 = scalar_lea.vmem [#allocation2], %s297_s9  ;;  %v2381_v51 = vld [vmem:[%s4083_s3 + $0xe8] sm:$0x3]  ;;  %v2383_v52 = vld [vmem:[%s4083_s3 + $0x100] sm:$0x3] }
  0x3f   : > { %356 = vst [vmem:[%s4103_s10] sm:$0xff] %v2359_v30  ;;  %358 = vst [vmem:[%s4103_s10 + $0x8] sm:$0xff] %v2360_v31  ;;  %v2385_v53 = vld [vmem:[%s4083_s3 + $0x118] sm:$0x3]  ;;  %v2387_v54 = vld [vmem:[%s4083_s3 + $0x130] sm:$0x3] }
  0x40   : > { %360 = vst [vmem:[%s4103_s10 + $0x18] sm:$0xff] %v2361_v32  ;;  %362 = vst [vmem:[%s4103_s10 + $0x20] sm:$0xff] %v2362_v33  ;;  %v2389_v55 = vld [vmem:[%s4083_s3 + $0x148] sm:$0x3]  ;;  %v2391_v56 = vld [vmem:[%s4083_s3 + $0x160] sm:$0x3] }
  0x41   : > { %364 = vst [vmem:[%s4103_s10 + $0x30] sm:$0xff] %v2363_v34  ;;  %366 = vst [vmem:[%s4103_s10 + $0x38] sm:$0xff] %v2364_v35  ;;  %v2393_v57 = vld [vmem:[%s4083_s3 + $0x178] sm:$0x3]  ;;  %v2395_v58 = vld [vmem:[%s4083_s3 + $0x190] sm:$0x3] }
  0x42   : > { %368 = vst [vmem:[%s4103_s10 + $0x48] sm:$0xff] %v2365_v36  ;;  %370 = vst [vmem:[%s4103_s10 + $0x50] sm:$0xff] %v2366_v37  ;;  %v2397_v59 = vld [vmem:[%s4083_s3 + $0x1a8] sm:$0x3] }
  0x43   : > { %372 = vst [vmem:[%s4103_s10 + $0x60] sm:$0xff] %v2367_v38  ;;  %374 = vst [vmem:[%s4103_s10 + $0x68] sm:$0xff] %v2368_v39 }
  0x44   : > { %376 = vst [vmem:[%s4103_s10 + $0x78] sm:$0xff] %v2369_v40  ;;  %378 = vst [vmem:[%s4103_s10 + $0x80] sm:$0xff] %v2370_v41 }
  0x45   : > { %380 = vst [vmem:[%s4103_s10 + $0x90] sm:$0xff] %v2371_v42  ;;  %382 = vst [vmem:[%s4103_s10 + $0x98] sm:$0xff] %v2372_v43 }
  0x46   : > { %384 = vst [vmem:[%s4103_s10 + $0xa8] sm:$0xff] %v2373_v44  ;;  %386 = vst [vmem:[%s4103_s10 + $0xb0] sm:$0xff] %v2374_v45 }
  0x47   : > { %388 = vst [vmem:[%s4103_s10 + $0xc0] sm:$0xff] %v2375_v46  ;;  %390 = vst [vmem:[%s4103_s10 + $0xc8] sm:$0xff] %v2376_v47 }
  0x48   : > { %392 = vst [vmem:[%s4103_s10 + $0xd8] sm:$0xff] %v2377_v48  ;;  %394 = vst [vmem:[%s4103_s10 + $0xe0] sm:$0xff] %v2378_v49 }
  0x49   : > { %2380 = vst [vmem:[%s4103_s10 + $0x10] sm:$0x3] %v2379_v50  ;;  %2382 = vst [vmem:[%s4103_s10 + $0x28] sm:$0x3] %v2381_v51 }
  0x4a   : > { %2384 = vst [vmem:[%s4103_s10 + $0x40] sm:$0x3] %v2383_v52  ;;  %2386 = vst [vmem:[%s4103_s10 + $0x58] sm:$0x3] %v2385_v53 }
  0x4b   : > { %2388 = vst [vmem:[%s4103_s10 + $0x70] sm:$0x3] %v2387_v54  ;;  %2390 = vst [vmem:[%s4103_s10 + $0x88] sm:$0x3] %v2389_v55 }
  0x4c   : > { %2392 = vst [vmem:[%s4103_s10 + $0xa0] sm:$0x3] %v2391_v56  ;;  %2394 = vst [vmem:[%s4103_s10 + $0xb8] sm:$0x3] %v2393_v57 }
  0x4d   : > { %2396 = vst [vmem:[%s4103_s10 + $0xd0] sm:$0x3] %v2395_v58  ;;  %2398 = vst [vmem:[%s4103_s10 + $0xe8] sm:$0x3] %v2397_v59 }
  0x4e   : > { %427 = vsyncadd %s299_s4, 2880 }
  0x4f PF: > { %s428_s5 = smul.u32 240, %s4932_s29  ;;  %s430_s7 = scalar_lea.sflag [#allocation3], %s4932_s29 }
  0x51   : > { %s4152_s6 = scalar_lea.vmem [#allocation2], %s428_s5 }
  0x52   : > { %3921 = dma.done.wait %s430_s7, 2880 }
  0x53   : > { %3922 = vsyncadd %s430_s7, 4294964416  ;;  %v2409_v60 = vld [vmem:[%s4915_s1 + $0x80] sm:$0xff]  ;;  %v2410_v61 = vld [vmem:[%s4915_s1 + $0x88] sm:$0xff] }
  0x54   : > { %v2489_v62 = vld [vmem:[%s4915_s1 + $0x200] sm:$0xff]  ;;  %v3429_v63 = vpack.c.bf16 %v2410_v61, %v2409_v60  ;;  %v2490_v0 = vld [vmem:[%s4915_s1 + $0x208] sm:$0xff]  ;;  %v2411_v1 = vld [vmem:[%s4915_s1 + $0x90] sm:$0xff] }
  0x55   : > { %v2412_v2 = vld [vmem:[%s4915_s1 + $0x98] sm:$0xff]  ;;  %v3557_v3 = vpack.c.bf16 %v2490_v0, %v2489_v62  ;;  %v2491_v5 = vld [vmem:[%s4915_s1 + $0x210] sm:$0xff]  ;;  %v2413_v7 = vld [vmem:[%s4915_s1 + $0xa0] sm:$0xff] }
  0x56   : > { %v3433_v4 = vpack.c.bf16 %v2412_v2, %v2411_v1  ;;  %v2492_v6 = vld [vmem:[%s4915_s1 + $0x218] sm:$0xff]  ;;  %3430 = vmatprep.subr.bf16.mxu1 %v3429_v63  ;;  %v2414_v9 = vld [vmem:[%s4915_s1 + $0xa8] sm:$0xff]  ;;  %v2493_v10 = vld [vmem:[%s4915_s1 + $0x220] sm:$0xff] }
  0x57   : > { %v3561_v8 = vpack.c.bf16 %v2492_v6, %v2491_v5  ;;  %v2494_v11 = vld [vmem:[%s4915_s1 + $0x228] sm:$0xff]  ;;  %3558 = vmatprep.subr.bf16.mxu0 %v3557_v3  ;;  %3432 = vmatpush3.bf16.msra.mxu1 %v3429_v63  ;;  %v3437_v12 = vpack.c.bf16 %v2414_v9, %v2413_v7  ;;  %v2415_v14 = vld [vmem:[%s4915_s1 + $0xb0] sm:$0xff]  ;;  %v2416_v15 = vld [vmem:[%s4915_s1 + $0xb8] sm:$0xff] }
  0x58   : > { %3560 = vmatpush3.bf16.msra.mxu0 %v3557_v3  ;;  %3434 = vmatprep.subr.bf16.mxu1 %v3433_v4  ;;  %v3565_v13 = vpack.c.bf16 %v2494_v11, %v2493_v10  ;;  %v2495_v16 = vld [vmem:[%s4915_s1 + $0x230] sm:$0xff]  ;;  %v2496_v17 = vld [vmem:[%s4915_s1 + $0x238] sm:$0xff]  ;;  %v3441_v18 = vpack.c.bf16 %v2416_v15, %v2415_v14  ;;  %v2417_v20 = vld [vmem:[%s4915_s1 + $0xc0] sm:$0xff] }
  0x59   : > { %3562 = vmatprep.subr.bf16.mxu0 %v3561_v8  ;;  %v3569_v19 = vpack.c.bf16 %v2496_v17, %v2495_v16  ;;  %v2418_v21 = vld [vmem:[%s4915_s1 + $0xc8] sm:$0xff]  ;;  %v2497_v23 = vld [vmem:[%s4915_s1 + $0x240] sm:$0xff]  ;;  %v2419_v28 = vld [vmem:[%s4915_s1 + $0xd0] sm:$0xff] }
  0x5a   : > { %v467_v22 = vld [vmem:[%s4152_s6 + $0x1] sm:$0xff]  ;;  %v4217_v25 = vld [vmem:[%s4152_s6 + $0x19] sm:$0xff]  ;;  %v3445_v26 = vpack.c.bf16 %v2418_v21, %v2417_v20  ;;  %v468_v54 = vld [vmem:[%s4152_s6 + $0x9] sm:$0xff] }
  0x5b   : > { %3436 = vmatpush3.bf16.msra.mxu1 %v3433_v4  ;;  %v2498_v24 = vld [vmem:[%s4915_s1 + $0x248] sm:$0xff]  ;;  %2957 = vmatprep.mubr.f32.mxu1 %v467_v22  ;;  %v2420_v29 = vld [vmem:[%s4915_s1 + $0xd8] sm:$0xff]  ;;  %v2499_v30 = vld [vmem:[%s4915_s1 + $0x250] sm:$0xff] }
  0x5c   : > { %3564 = vmatpush3.bf16.msra.mxu0 %v3561_v8  ;;  %3438 = vmatprep.subr.bf16.mxu1 %v3437_v12  ;;  %v3573_v27 = vpack.c.bf16 %v2498_v24, %v2497_v23  ;;  %v2500_v31 = vld [vmem:[%s4915_s1 + $0x258] sm:$0xff]  ;;  %v3449_v32 = vpack.c.bf16 %v2420_v29, %v2419_v28  ;;  %v2421_v34 = vld [vmem:[%s4915_s1 + $0xe0] sm:$0xff]  ;;  %v2422_v35 = vld [vmem:[%s4915_s1 + $0xe8] sm:$0xff] }
  0x5d   : > { %3566 = vmatprep.subr.bf16.mxu0 %v3565_v13  ;;  %3181 = vmatprep.mubr.f32.mxu0 %v4217_v25  ;;  %v3577_v33 = vpack.c.bf16 %v2500_v31, %v2499_v30  ;;  %v2501_v36 = vld [vmem:[%s4915_s1 + $0x260] sm:$0xff]  ;;  %v2502_v37 = vld [vmem:[%s4915_s1 + $0x268] sm:$0xff]  ;;  %v3453_v38 = vpack.c.bf16 %v2422_v35, %v2421_v34  ;;  %v2423_v40 = vld [vmem:[%s4915_s1 + $0xf0] sm:$0xff] }
  0x5e   : > { %v3581_v39 = vpack.c.bf16 %v2502_v37, %v2501_v36  ;;  %v2424_v41 = vld [vmem:[%s4915_s1 + $0xf8] sm:$0xff]  ;;  %v2503_v42 = vld [vmem:[%s4915_s1 + $0x270] sm:$0xff]  ;;  %v451_v46 = vld [vmem:[%s4915_s1] sm:$0xff] }
  0x5f   : > { %3440 = vmatpush3.bf16.msra.mxu1 %v3437_v12  ;;  %v2504_v43 = vld [vmem:[%s4915_s1 + $0x278] sm:$0xff]  ;;  %v3457_v44 = vpack.c.bf16 %v2424_v41, %v2423_v40  ;;  %v452_v47 = vld [vmem:[%s4915_s1 + $0x8] sm:$0xff]  ;;  %v2521_v48 = vld [vmem:[%s4915_s1 + $0x280] sm:$0xff] }
  0x60   : > { %3568 = vmatpush3.bf16.msra.mxu0 %v3565_v13  ;;  %3442 = vmatprep.subr.bf16.mxu1 %v3441_v18  ;;  %v3585_v45 = vpack.c.bf16 %v2504_v43, %v2503_v42  ;;  %v2522_v49 = vld [vmem:[%s4915_s1 + $0x288] sm:$0xff]  ;;  %v3461_v50 = vpack.c.bf16 %v452_v47, %v451_v46  ;;  %v453_v52 = vld [vmem:[%s4915_s1 + $0x10] sm:$0xff]  ;;  %v454_v53 = vld [vmem:[%s4915_s1 + $0x18] sm:$0xff] }
  0x61   : > { %3570 = vmatprep.subr.bf16.mxu0 %v3569_v19  ;;  %v3589_v51 = vpack.c.bf16 %v2522_v49, %v2521_v48  ;;  %v2523_v55 = vld [vmem:[%s4915_s1 + $0x290] sm:$0xff]  ;;  %v2524_v56 = vld [vmem:[%s4915_s1 + $0x298] sm:$0xff]  ;;  %v3465_v58 = vpack.c.bf16 %v454_v53, %v453_v52  ;;  %v455_v61 = vld [vmem:[%s4915_s1 + $0x20] sm:$0xff] }
  0x62   : > { %v2474_v57 = vld [vmem:[%s4152_s6 + $0x21] sm:$0xff]  ;;  %v4283_v59 = vld [vmem:[%s4152_s6 + $0x31] sm:$0xff]  ;;  %v3593_v60 = vpack.c.bf16 %v2524_v56, %v2523_v55  ;;  %v4299_v1 = vld [vmem:[%s4152_s6 + $0x39] sm:$0xff] }
  0x63   : > { %3444 = vmatpush3.bf16.msra.mxu1 %v3441_v18  ;;  %v456_v62 = vld [vmem:[%s4915_s1 + $0x28] sm:$0xff]  ;;  %v2525_v63 = vld [vmem:[%s4915_s1 + $0x2a0] sm:$0xff]  ;;  %v457_v5 = vld [vmem:[%s4915_s1 + $0x30] sm:$0xff] }
  0x64   : > { %3572 = vmatpush3.bf16.msra.mxu0 %v3569_v19  ;;  %3446 = vmatprep.subr.bf16.mxu1 %v3445_v26  ;;  %v2526_v0 = vld [vmem:[%s4915_s1 + $0x2a8] sm:$0xff]  ;;  %v3469_v2 = vpack.c.bf16 %v456_v62, %v455_v61  ;;  %v458_v6 = vld [vmem:[%s4915_s1 + $0x38] sm:$0xff]  ;;  %v2527_v7 = vld [vmem:[%s4915_s1 + $0x2b0] sm:$0xff] }
  0x65   : > { %3574 = vmatprep.subr.bf16.mxu0 %v3573_v27  ;;  %v4303_v3 = vld [vmem:[%s4152_s6 + $0x49] sm:$0xff]  ;;  %v3597_v4 = vpack.c.bf16 %v2526_v0, %v2525_v63  ;;  %v4320_v9 = vld [vmem:[%s4152_s6 + $0x51] sm:$0xff]  ;;  %v3473_v10 = vpack.c.bf16 %v458_v6, %v457_v5  ;;  %v4325_v11 = vld [vmem:[%s4152_s6 + $0x61] sm:$0xff] }
  0x66   : > { %v2528_v8 = vld [vmem:[%s4915_s1 + $0x2b8] sm:$0xff]  ;;  %v459_v13 = vld [vmem:[%s4915_s1 + $0x40] sm:$0xff]  ;;  %v460_v14 = vld [vmem:[%s4915_s1 + $0x48] sm:$0xff] }
  0x67   : > { %3448 = vmatpush3.bf16.msra.mxu1 %v3445_v26  ;;  %v3601_v12 = vpack.c.bf16 %v2528_v8, %v2527_v7  ;;  %v2529_v15 = vld [vmem:[%s4915_s1 + $0x2c0] sm:$0xff]  ;;  %v2530_v16 = vld [vmem:[%s4915_s1 + $0x2c8] sm:$0xff]  ;;  %v3477_v18 = vpack.c.bf16 %v460_v14, %v459_v13  ;;  %v461_v21 = vld [vmem:[%s4915_s1 + $0x50] sm:$0xff] }
  0x68   : > { %3576 = vmatpush3.bf16.msra.mxu0 %v3573_v27  ;;  %3450 = vmatprep.subr.bf16.mxu1 %v3449_v32  ;;  %v4342_v17 = vld [vmem:[%s4152_s6 + $0x69] sm:$0xff]  ;;  %v4347_v19 = vld [vmem:[%s4152_s6 + $0x79] sm:$0xff]  ;;  %v3605_v20 = vpack.c.bf16 %v2530_v16, %v2529_v15  ;;  %v4369_v27 = vld [vmem:[%s4152_s6 + $0x91] sm:$0xff] }
  0x69   : > { %3578 = vmatprep.subr.bf16.mxu0 %v3577_v33  ;;  %v462_v22 = vld [vmem:[%s4915_s1 + $0x58] sm:$0xff]  ;;  %v2531_v23 = vld [vmem:[%s4915_s1 + $0x2d0] sm:$0xff]  ;;  %v463_v29 = vld [vmem:[%s4915_s1 + $0x60] sm:$0xff] }
  0x6a   : > { %v2532_v24 = vld [vmem:[%s4915_s1 + $0x2d8] sm:$0xff]  ;;  %v3481_v26 = vpack.c.bf16 %v462_v22, %v461_v21  ;;  %v464_v30 = vld [vmem:[%s4915_s1 + $0x68] sm:$0xff]  ;;  %v2533_v31 = vld [vmem:[%s4915_s1 + $0x2e0] sm:$0xff] }
  0x6b   : > { %3452 = vmatpush3.bf16.msra.mxu1 %v3449_v32  ;;  %v3609_v28 = vpack.c.bf16 %v2532_v24, %v2531_v23  ;;  %v2534_v32 = vld [vmem:[%s4915_s1 + $0x2e8] sm:$0xff]  ;;  %v3485_v34 = vpack.c.bf16 %v464_v30, %v463_v29  ;;  %v465_v37 = vld [vmem:[%s4915_s1 + $0x70] sm:$0xff]  ;;  %v2536_v40 = vld [vmem:[%s4915_s1 + $0x2f8] sm:$0xff] }
  0x6c   : > { %3580 = vmatpush3.bf16.msra.mxu0 %v3577_v33  ;;  %3454 = vmatprep.subr.bf16.mxu1 %v3453_v38  ;;  %v4386_v33 = vld [vmem:[%s4152_s6 + $0x99] sm:$0xff]  ;;  %v4391_v35 = vld [vmem:[%s4152_s6 + $0xa9] sm:$0xff]  ;;  %v3613_v36 = vpack.c.bf16 %v2534_v32, %v2533_v31  ;;  %v4408_v41 = vld [vmem:[%s4152_s6 + $0xb1] sm:$0xff] }
  0x6d   : > { %3582 = vmatprep.subr.bf16.mxu0 %v3581_v39  ;;  %v4413_v43 = vld [vmem:[%s4152_s6 + $0xc1] sm:$0xff]  ;;  %v4430_v49 = vld [vmem:[%s4152_s6 + $0xc9] sm:$0xff]  ;;  %v4457_v61 = vld [vmem:[%s4152_s6 + $0x18] sm:$0xff] }
  0x6e   : > { %v2426_v46 = vld [vmem:[%s4915_s1 + $0x108] sm:$0xff]  ;;  %v2553_v47 = vld [vmem:[%s4915_s1 + $0x300] sm:$0xff]  ;;  %v2428_v55 = vld [vmem:[%s4915_s1 + $0x118] sm:$0xff] }
  0x6f   : > { %3456 = vmatpush3.bf16.msra.mxu1 %v3453_v38  ;;  %v466_v38 = vld [vmem:[%s4915_s1 + $0x78] sm:$0xff]  ;;  %v2554_v48 = vld [vmem:[%s4915_s1 + $0x308] sm:$0xff]  ;;  %v4470_v5 = vld [vmem:[%s4152_s6 + $0x20] sm:$0xff] }
  0x70   : > { %3584 = vmatpush3.bf16.msra.mxu0 %v3581_v39  ;;  %3458 = vmatprep.subr.bf16.mxu1 %v3457_v44  ;;  %v2535_v39 = vld [vmem:[%s4915_s1 + $0x2f0] sm:$0xff]  ;;  %v3489_v42 = vpack.c.bf16 %v466_v38, %v465_v37  ;;  %v3621_v53 = vpack.c.bf16 %v2554_v48, %v2553_v47  ;;  %v436_v56 = vld [vmem:[%s4152_s6 + $0x8] sm:$0xff]  ;;  %v2557_v6 = vld [vmem:[%s4915_s1 + $0x320] sm:$0xff] }
  0x71   : > { %3586 = vmatprep.subr.bf16.mxu0 %v3585_v45  ;;  %v4436_v52 = vld [vmem:[%s4152_s6 + $0x1a] sm:$0xff]  ;;  %v4460_v63 = vld [vmem:[%s4152_s6 + $0x32] sm:$0xff]  ;;  %v4488_v13 = vld [vmem:[%s4152_s6 + $0x4a] sm:$0xff] }
  0x72   : > { %v2558_v7 = vld [vmem:[%s4915_s1 + $0x328] sm:$0xff]  ;;  %v2431_v15 = vld [vmem:[%s4915_s1 + $0x130] sm:$0xff]  ;;  %v2432_v16 = vld [vmem:[%s4915_s1 + $0x138] sm:$0xff] }
  0x73   : > { %3460 = vmatpush3.bf16.msra.mxu1 %v3457_v44  ;;  %v3617_v44 = vpack.c.bf16 %v2536_v40, %v2535_v39  ;;  %v4480_v8 = vld [vmem:[%s4152_s6 + $0x3a] sm:$0xff]  ;;  %v3629_v14 = vpack.c.bf16 %v2558_v7, %v2557_v6  ;;  %v4508_v22 = vld [vmem:[%s4152_s6 + $0x52] sm:$0xff]  ;;  %v4512_v23 = vld [vmem:[%s4152_s6 + $0x48] sm:$0xff]  ;;  %v3505_v24 = vpack.c.bf16 %v2432_v16, %v2431_v15 }
  0x74   : > { %3588 = vmatpush3.bf16.msra.mxu0 %v3585_v45  ;;  %3462 = vmatprep.subr.bf16.mxu1 %v3461_v50  ;;  %v2425_v45 = vld [vmem:[%s4915_s1 + $0x100] sm:$0xff]  ;;  %v2560_v21 = vld [vmem:[%s4915_s1 + $0x338] sm:$0xff]  ;;  %v2434_v30 = vld [vmem:[%s4915_s1 + $0x148] sm:$0xff] }
  0x75   : > { %3590 = vmatprep.subr.bf16.mxu0 %v3589_v51  ;;  %v2433_v29 = vld [vmem:[%s4915_s1 + $0x140] sm:$0xff]  ;;  %v2564_v47 = vld [vmem:[%s4915_s1 + $0x358] sm:$0xff]  ;;  %v2567_v16 = vld [vmem:[%s4915_s1 + $0x370] sm:$0xff] }
  0x76   : > { %2958 = vmatmul.mubr.f32.vlgmr.msra.gmra.mrb[0].mxu1 %v468_v54  ;;  %v2427_v54 = vld [vmem:[%s4915_s1 + $0x110] sm:$0xff]  ;;  %v2561_v32 = vld [vmem:[%s4915_s1 + $0x340] sm:$0xff]  ;;  %v3509_v38 = vpack.c.bf16 %v2434_v30, %v2433_v29  ;;  %v4610_v15 = vld [vmem:[%s4152_s6 + $0x98] sm:$0xff] }
  0x77   : > { %3182 = vmatmul.mubr.f32.vlgmr.msra.gmra.mrb[0].mxu0 %v2474_v57  ;;  %3464 = vmatpush3.bf16.msra.mxu1 %v3461_v50  ;;  %v435_v50 = vld [vmem:[%s4152_s6] sm:$0xff]  ;;  %v3497_v62 = vpack.c.bf16 %v2428_v55, %v2427_v54  ;;  %v4526_v31 = vld [vmem:[%s4152_s6 + $0x50] sm:$0xff] }
  0x78   : > { %3592 = vmatpush3.bf16.msra.mxu0 %v3589_v51  ;;  %2960 = vmatprep.mubr.f32.mxu1 %v4217_v25  ;;  %v4364_v25 = vld [vmem:[%s4152_s6 + $0x81] sm:$0xff]  ;;  %v3493_v51 = vpack.c.bf16 %v2426_v46, %v2425_v45  ;;  %v4600_v6 = vld [vmem:[%s4152_s6 + $0xaa] sm:$0xff] }
  0x79   : > { %3184 = vmatprep.mubr.f32.mxu0 %v4283_v59  ;;  %3466 = vmatprep.subr.bf16.mxu1 %v3465_v58  ;;  %v4540_v37 = vld [vmem:[%s4152_s6 + $0x60] sm:$0xff]  ;;  %v4554_v45 = vld [vmem:[%s4152_s6 + $0x68] sm:$0xff] }
  0x7a   : > { %2961 = vmatmul.mubr.f32.gmra.mrb[2].mxu1 %v2474_v57  ;;  %3594 = vmatprep.subr.bf16.mxu0 %v3593_v60  ;;  %v2555_v57 = vld [vmem:[%s4915_s1 + $0x310] sm:$0xff]  ;;  %v2437_v55 = vld [vmem:[%s4915_s1 + $0x160] sm:$0xff] }
  0x7b   : > { %3185 = vmatmul.mubr.f32.gmra.mrb[2].mxu0 %v4299_v1  ;;  %3468 = vmatpush3.bf16.msra.mxu1 %v3465_v58  ;;  %v2556_v58 = vld [vmem:[%s4915_s1 + $0x318] sm:$0xff]  ;;  %v2563_v46 = vld [vmem:[%s4915_s1 + $0x350] sm:$0xff] }
  0x7c   : > { %3596 = vmatpush3.bf16.msra.mxu0 %v3593_v60  ;;  %2963 = vmatprep.mubr.f32.mxu1 %v4283_v59  ;;  %v4453_v60 = vld [vmem:[%s4152_s6 + $0x22] sm:$0xff]  ;;  %v3625_v0 = vpack.c.bf16 %v2556_v58, %v2555_v57  ;;  %v4544_v39 = vld [vmem:[%s4152_s6 + $0x7a] sm:$0xff]  ;;  %v3641_v54 = vpack.c.bf16 %v2564_v47, %v2563_v46 }
  0x7d   : > { %3187 = vmatprep.mubr.f32.mxu0 %v4303_v3  ;;  %3470 = vmatprep.subr.bf16.mxu1 %v3469_v2  ;;  %v4564_v48 = vld [vmem:[%s4152_s6 + $0x82] sm:$0xff] }
  0x7e   : > { %2964 = vmatmul.mubr.f32.gmra.mrb[4].mxu1 %v4299_v1  ;;  %3598 = vmatprep.subr.bf16.mxu0 %v3597_v4  ;;  %v4582_v57 = vld [vmem:[%s4152_s6 + $0x80] sm:$0xff] }
  0x7f   : > { %3188 = vmatmul.mubr.f32.gmra.mrb[4].mxu0 %v4320_v9  ;;  %3472 = vmatpush3.bf16.msra.mxu1 %v3469_v2  ;;  %v2429_v2 = vld [vmem:[%s4915_s1 + $0x120] sm:$0xff] }
  0x80   : > { %3600 = vmatpush3.bf16.msra.mxu0 %v3597_v4  ;;  %2966 = vmatprep.mubr.f32.mxu1 %v4303_v3  ;;  %v2430_v4 = vld [vmem:[%s4915_s1 + $0x128] sm:$0xff]  ;;  %v2565_v58 = vld [vmem:[%s4915_s1 + $0x360] sm:$0xff] }
  0x81   : > { %3190 = vmatprep.mubr.f32.mxu0 %v4325_v11  ;;  %3474 = vmatprep.subr.bf16.mxu1 %v3473_v10  ;;  %v4628_v29 = vld [vmem:[%s4152_s6 + $0xc2] sm:$0xff] }
  0x82   : > { %2967 = vmatmul.mubr.f32.gmra.mrb[6].mxu1 %v4320_v9  ;;  %3602 = vmatprep.subr.bf16.mxu0 %v3601_v12  ;;  %v790_v46 = vld [vmem:[%s4152_s6 + $0x2] sm:$0xff] }
  0x83   : > { %3191 = vmatmul.mubr.f32.gmra.mrb[6].mxu0 %v4342_v17  ;;  %3476 = vmatpush3.bf16.msra.mxu1 %v3473_v10  ;;  %v4484_v10 = vld [vmem:[%s4152_s6 + $0x30] sm:$0xff] }
  0x84   : > { %3604 = vmatpush3.bf16.msra.mxu0 %v3601_v12  ;;  %2969 = vmatprep.mubr.f32.mxu1 %v4325_v11  ;;  %v3501_v12 = vpack.c.bf16 %v2430_v4, %v2429_v2  ;;  %v4596_v2 = vld [vmem:[%s4152_s6 + $0x90] sm:$0xff] }
  0x85   : > { %3193 = vmatprep.mubr.f32.mxu0 %v4347_v19  ;;  %3478 = vmatprep.subr.bf16.mxu1 %v3477_v18 }
  0x86   : > { %2970 = vmatmul.mubr.f32.gmra.mrb[8].mxu1 %v4342_v17  ;;  %3606 = vmatprep.subr.bf16.mxu0 %v3605_v20 }
  0x87   : > { %3194 = vmatmul.mubr.f32.gmra.mrb[8].mxu0 %v4364_v25  ;;  %3480 = vmatpush3.bf16.msra.mxu1 %v3477_v18  ;;  %v4498_v18 = vld [vmem:[%s4152_s6 + $0x38] sm:$0xff] }
  0x88   : > { %3608 = vmatpush3.bf16.msra.mxu0 %v3605_v20  ;;  %2972 = vmatprep.mubr.f32.mxu1 %v4347_v19  ;;  %v2559_v20 = vld [vmem:[%s4915_s1 + $0x330] sm:$0xff] }
  0x89   : > { %3196 = vmatprep.mubr.f32.mxu0 %v4369_v27  ;;  %3482 = vmatprep.subr.bf16.mxu1 %v3481_v26 }
  0x8a   : > { %2973 = vmatmul.mubr.f32.gmra.mrb[10].mxu1 %v4364_v25  ;;  %3610 = vmatprep.subr.bf16.mxu0 %v3609_v28 }
  0x8b   : > { %3197 = vmatmul.mubr.f32.gmra.mrb[10].mxu0 %v4386_v33  ;;  %3484 = vmatpush3.bf16.msra.mxu1 %v3481_v26  ;;  %v4516_v26 = vld [vmem:[%s4152_s6 + $0x62] sm:$0xff] }
  0x8c   : > { %3612 = vmatpush3.bf16.msra.mxu0 %v3609_v28  ;;  %2975 = vmatprep.mubr.f32.mxu1 %v4369_v27  ;;  %v3633_v28 = vpack.c.bf16 %v2560_v21, %v2559_v20  ;;  %v2568_v20 = vld [vmem:[%s4915_s1 + $0x378] sm:$0xff] }
  0x8d   : > { %3199 = vmatprep.mubr.f32.mxu0 %v4391_v35  ;;  %3486 = vmatprep.subr.bf16.mxu1 %v3485_v34  ;;  %v4620_v21 = vld [vmem:[%s4152_s6 + $0xb2] sm:$0xff]  ;;  %v3649_v30 = vpack.c.bf16 %v2568_v20, %v2567_v16 }
  0x8e   : > { %2976 = vmatmul.mubr.f32.gmra.mrb[12].mxu1 %v4386_v33  ;;  %3614 = vmatprep.subr.bf16.mxu0 %v3613_v36  ;;  %v2589_v16 = vld [vmem:[%s4915_s1 + $0x3a0] sm:$0xff]  ;;  %v2590_v20 = vld [vmem:[%s4915_s1 + $0x3a8] sm:$0xff] }
  0x8f   : > { %3200 = vmatmul.mubr.f32.gmra.mrb[12].mxu0 %v4408_v41  ;;  %3488 = vmatpush3.bf16.msra.mxu1 %v3485_v34  ;;  %v2562_v34 = vld [vmem:[%s4915_s1 + $0x348] sm:$0xff] }
  0x90   : > { %3616 = vmatpush3.bf16.msra.mxu0 %v3613_v36  ;;  %2978 = vmatprep.mubr.f32.mxu1 %v4391_v35  ;;  %v4536_v36 = vld [vmem:[%s4152_s6 + $0x6a] sm:$0xff]  ;;  %v3637_v40 = vpack.c.bf16 %v2562_v34, %v2561_v32 }
  0x91   : > { %3202 = vmatprep.mubr.f32.mxu0 %v4413_v43  ;;  %3490 = vmatprep.subr.bf16.mxu1 %v3489_v42  ;;  %v2457_v32 = vld [vmem:[%s4915_s1 + $0x180] sm:$0xff]  ;;  %v2458_v34 = vld [vmem:[%s4915_s1 + $0x188] sm:$0xff] }
  0x92   : > { %2979 = vmatmul.mubr.f32.gmra.mrb[14].mxu1 %v4408_v41  ;;  %3618 = vmatprep.subr.bf16.mxu0 %v3617_v44  ;;  %v3525_v47 = vpack.c.bf16 %v2458_v34, %v2457_v32  ;;  %v2463_v32 = vld [vmem:[%s4915_s1 + $0x1b0] sm:$0xff]  ;;  %v2464_v34 = vld [vmem:[%s4915_s1 + $0x1b8] sm:$0xff] }
  0x93   : > { %3203 = vmatmul.mubr.f32.gmra.mrb[14].mxu0 %v4430_v49  ;;  %3492 = vmatpush3.bf16.msra.mxu1 %v3489_v42  ;;  %v2435_v42 = vld [vmem:[%s4915_s1 + $0x150] sm:$0xff] }
  0x94   : > { %3620 = vmatpush3.bf16.msra.mxu0 %v3617_v44  ;;  %3013 = vmatprep.mubr.f32.mxu1 %v435_v50  ;;  %v2436_v44 = vld [vmem:[%s4915_s1 + $0x158] sm:$0xff] }
  0x95   : > { %3237 = vmatprep.mubr.f32.mxu0 %v4436_v52  ;;  %3494 = vmatprep.subr.bf16.mxu1 %v3493_v51  ;;  %v4568_v50 = vld [vmem:[%s4152_s6 + $0x78] sm:$0xff] }
  0x96   : > { %3014 = vmatmul.mubr.f32.vlgmr.msra.gmra.mrb[0].mxu1 %v436_v56  ;;  %3622 = vmatprep.subr.bf16.mxu0 %v3621_v53  ;;  %v2438_v56 = vld [vmem:[%s4915_s1 + $0x168] sm:$0xff] }
  0x97   : > { %3238 = vmatmul.mubr.f32.vlgmr.msra.gmra.mrb[0].mxu0 %v4453_v60  ;;  %3496 = vmatpush3.bf16.msra.mxu1 %v3493_v51  ;;  %v3513_v51 = vpack.c.bf16 %v2436_v44, %v2435_v42  ;;  %v3517_v4 = vpack.c.bf16 %v2438_v56, %v2437_v55  ;;  %v2586_v42 = vld [vmem:[%s4915_s1 + $0x388] sm:$0xff]  ;;  %v2460_v55 = vld [vmem:[%s4915_s1 + $0x198] sm:$0xff] }
  0x98   : > { %3624 = vmatpush3.bf16.msra.mxu0 %v3621_v53  ;;  %3016 = vmatprep.mubr.f32.mxu1 %v4457_v61  ;;  %v4572_v53 = vld [vmem:[%s4152_s6 + $0x92] sm:$0xff]  ;;  %v4648_v44 = vld [vmem:[%s4152_s6 + $0xca] sm:$0xff] }
  0x99   : > { %3240 = vmatprep.mubr.f32.mxu0 %v4460_v63  ;;  %3498 = vmatprep.subr.bf16.mxu1 %v3497_v62  ;;  %v791_v56 = vld [vmem:[%s4152_s6 + $0xa] sm:$0xff] }
  0x9a   : > { %3017 = vmatmul.mubr.f32.gmra.mrb[2].mxu1 %v4470_v5  ;;  %3626 = vmatprep.subr.bf16.mxu0 %v3625_v0 }
  0x9b   : > { %3241 = vmatmul.mubr.f32.gmra.mrb[2].mxu0 %v4480_v8  ;;  %3500 = vmatpush3.bf16.msra.mxu1 %v3497_v62  ;;  %v2566_v62 = vld [vmem:[%s4915_s1 + $0x368] sm:$0xff] }
  0x9c   : > { %3628 = vmatpush3.bf16.msra.mxu0 %v3625_v0  ;;  %3019 = vmatprep.mubr.f32.mxu1 %v4484_v10  ;;  %v4592_v0 = vld [vmem:[%s4152_s6 + $0x9a] sm:$0xff]  ;;  %v3645_v7 = vpack.c.bf16 %v2566_v62, %v2565_v58 }
  0x9d   : > { %3243 = vmatprep.mubr.f32.mxu0 %v4488_v13  ;;  %3502 = vmatprep.subr.bf16.mxu1 %v3501_v12  ;;  %v2587_v58 = vld [vmem:[%s4915_s1 + $0x390] sm:$0xff]  ;;  %v2588_v62 = vld [vmem:[%s4915_s1 + $0x398] sm:$0xff] }
  0x9e   : > { %3020 = vmatmul.mubr.f32.gmra.mrb[4].mxu1 %v4498_v18  ;;  %3630 = vmatprep.subr.bf16.mxu0 %v3629_v14 }
  0x9f   : > { %3244 = vmatmul.mubr.f32.gmra.mrb[4].mxu0 %v4508_v22  ;;  %3504 = vmatpush3.bf16.msra.mxu1 %v3501_v12  ;;  %v2439_v12 = vld [vmem:[%s4915_s1 + $0x170] sm:$0xff] }
  0xa0   : > { %3632 = vmatpush3.bf16.msra.mxu0 %v3629_v14  ;;  %3022 = vmatprep.mubr.f32.mxu1 %v4512_v23  ;;  %v2440_v14 = vld [vmem:[%s4915_s1 + $0x178] sm:$0xff] }
  0xa1   : > { %3246 = vmatprep.mubr.f32.mxu0 %v4516_v26  ;;  %3506 = vmatprep.subr.bf16.mxu1 %v3505_v24 }
  0xa2   : > { %3023 = vmatmul.mubr.f32.gmra.mrb[6].mxu1 %v4526_v31  ;;  %3634 = vmatprep.subr.bf16.mxu0 %v3633_v28 }
  0xa3   : > { %3247 = vmatmul.mubr.f32.gmra.mrb[6].mxu0 %v4536_v36  ;;  %3508 = vmatpush3.bf16.msra.mxu1 %v3505_v24  ;;  %v4624_v24 = vld [vmem:[%s4152_s6 + $0xa8] sm:$0xff] }
  0xa4   : > { %3636 = vmatpush3.bf16.msra.mxu0 %v3633_v28  ;;  %3025 = vmatprep.mubr.f32.mxu1 %v4540_v37  ;;  %v3521_v28 = vpack.c.bf16 %v2440_v14, %v2439_v12  ;;  %v2461_v12 = vld [vmem:[%s4915_s1 + $0x1a0] sm:$0xff]  ;;  %v2462_v14 = vld [vmem:[%s4915_s1 + $0x1a8] sm:$0xff] }
  0xa5   : > { %3249 = vmatprep.mubr.f32.mxu0 %v4544_v39  ;;  %3510 = vmatprep.subr.bf16.mxu1 %v3509_v38 }
  0xa6   : > { %3026 = vmatmul.mubr.f32.gmra.mrb[8].mxu1 %v4554_v45  ;;  %3638 = vmatprep.subr.bf16.mxu0 %v3637_v40 }
  0xa7   : > { %3250 = vmatmul.mubr.f32.gmra.mrb[8].mxu0 %v4564_v48  ;;  %3512 = vmatpush3.bf16.msra.mxu1 %v3509_v38  ;;  %v4638_v38 = vld [vmem:[%s4152_s6 + $0xb0] sm:$0xff] }
  0xa8   : > { %3640 = vmatpush3.bf16.msra.mxu0 %v3637_v40  ;;  %3028 = vmatprep.mubr.f32.mxu1 %v4568_v50  ;;  %v2585_v40 = vld [vmem:[%s4915_s1 + $0x380] sm:$0xff] }
  0xa9   : > { %3252 = vmatprep.mubr.f32.mxu0 %v4572_v53  ;;  %3514 = vmatprep.subr.bf16.mxu1 %v3513_v51 }
  0xaa   : > { %3029 = vmatmul.mubr.f32.gmra.mrb[10].mxu1 %v4582_v57  ;;  %3642 = vmatprep.subr.bf16.mxu0 %v3641_v54 }
  0xab   : > { %3253 = vmatmul.mubr.f32.gmra.mrb[10].mxu0 %v4592_v0  ;;  %3516 = vmatpush3.bf16.msra.mxu1 %v3513_v51  ;;  %v3653_v51 = vpack.c.bf16 %v2586_v42, %v2585_v40  ;;  %v3537_v40 = vpack.c.bf16 %v2464_v34, %v2463_v32  ;;  %v4749_v34 = vld [vmem:[%s4152_s6 + $0xc0] sm:$0xff] }
  0xac   : > { %3644 = vmatpush3.bf16.msra.mxu0 %v3641_v54  ;;  %3031 = vmatprep.mubr.f32.mxu1 %v4596_v2  ;;  %v2459_v54 = vld [vmem:[%s4915_s1 + $0x190] sm:$0xff] }
  0xad   : > { %3255 = vmatprep.mubr.f32.mxu0 %v4600_v6  ;;  %3518 = vmatprep.subr.bf16.mxu1 %v3517_v4 }
  0xae   : > { %3032 = vmatmul.mubr.f32.gmra.mrb[12].mxu1 %v4610_v15  ;;  %3646 = vmatprep.subr.bf16.mxu0 %v3645_v7 }
  0xaf   : > { %3256 = vmatmul.mubr.f32.gmra.mrb[12].mxu0 %v4620_v21  ;;  %3520 = vmatpush3.bf16.msra.mxu1 %v3517_v4  ;;  %v3529_v4 = vpack.c.bf16 %v2460_v55, %v2459_v54  ;;  %v2594_v54 = vld [vmem:[%s4915_s1 + $0x3c8] sm:$0xff] }
  0xb0   : > { %3648 = vmatpush3.bf16.msra.mxu0 %v3645_v7  ;;  %3034 = vmatprep.mubr.f32.mxu1 %v4624_v24  ;;  %v3657_v7 = vpack.c.bf16 %v2588_v62, %v2587_v58  ;;  %v2467_v58 = vld [vmem:[%s4915_s1 + $0x1d0] sm:$0xff]  ;;  %v2468_v62 = vld [vmem:[%s4915_s1 + $0x1d8] sm:$0xff] }
  0xb1   : > { %3258 = vmatprep.mubr.f32.mxu0 %v4628_v29  ;;  %3522 = vmatprep.subr.bf16.mxu1 %v3521_v28 }
  0xb2   : > { %3035 = vmatmul.mubr.f32.gmra.mrb[14].mxu1 %v4638_v38  ;;  %3650 = vmatprep.subr.bf16.mxu0 %v3649_v30 }
  0xb3   : > { %3259 = vmatmul.mubr.f32.gmra.mrb[14].mxu0 %v4648_v44  ;;  %3524 = vmatpush3.bf16.msra.mxu1 %v3521_v28  ;;  %v3533_v28 = vpack.c.bf16 %v2462_v14, %v2461_v12  ;;  %v3545_v12 = vpack.c.bf16 %v2468_v62, %v2467_v58  ;;  %v2618_v58 = vld [vmem:[%s4915_s1 + $0x408] sm:$0xff]  ;;  %v2552_v62 = vld [vmem:[%s4152_s6 + $0xe0] sm:$0xff] }
  0xb4   : > { %3652 = vmatpush3.bf16.msra.mxu0 %v3649_v30  ;;  %3069 = vmatprep.mubr.f32.mxu1 %v790_v46  ;;  %v3661_v30 = vpack.c.bf16 %v2590_v20, %v2589_v16  ;;  %v2465_v46 = vld [vmem:[%s4915_s1 + $0x1c0] sm:$0xff]  ;;  %v2470_v20 = vld [vmem:[%s4915_s1 + $0x1e8] sm:$0xff] }
  0xb5   : > { %3293 = vmatprep.mubr.f32.mxu0 %v4484_v10  ;;  %3526 = vmatprep.subr.bf16.mxu1 %v3525_v47  ;;  %v2469_v16 = vld [vmem:[%s4915_s1 + $0x1e0] sm:$0xff] }
  0xb6   : > { %3070 = vmatmul.mubr.f32.vlgmr.msra.gmra.mrb[0].mxu1 %v791_v56  ;;  %3654 = vmatprep.subr.bf16.mxu0 %v3653_v51  ;;  %v3549_v32 = vpack.c.bf16 %v2470_v20, %v2469_v16  ;;  %v2621_v16 = vld [vmem:[%s4915_s1 + $0x420] sm:$0xff]  ;;  %v2622_v20 = vld [vmem:[%s4915_s1 + $0x428] sm:$0xff] }
  0xb7   : > { %3294 = vmatmul.mubr.f32.vlgmr.msra.gmra.mrb[0].mxu0 %v4498_v18  ;;  %3528 = vmatpush3.bf16.msra.mxu1 %v3525_v47  ;;  %v2466_v47 = vld [vmem:[%s4915_s1 + $0x1c8] sm:$0xff] }
  0xb8   : > { %3656 = vmatpush3.bf16.msra.mxu0 %v3653_v51  ;;  %3072 = vmatprep.mubr.f32.mxu1 %v4436_v52  ;;  %v2591_v52 = vld [vmem:[%s4915_s1 + $0x3b0] sm:$0xff]  ;;  %v2593_v51 = vld [vmem:[%s4915_s1 + $0x3c0] sm:$0xff]  ;;  %v3541_v55 = vpack.c.bf16 %v2466_v47, %v2465_v46  ;;  %v2600_v46 = vld [vmem:[%s4915_s1 + $0x3f8] sm:$0xff] }
  0xb9   : > { %3296 = vmatprep.mubr.f32.mxu0 %v4512_v23  ;;  %3530 = vmatprep.subr.bf16.mxu1 %v3529_v4  ;;  %v3669_v56 = vpack.c.bf16 %v2594_v54, %v2593_v51  ;;  %v4766_v47 = vld [vmem:[%s4152_s6 + $0xc8] sm:$0xff]  ;;  %v2551_v54 = vld [vmem:[%s4152_s6 + $0xd8] sm:$0xff] }
  0xba   : > { %3073 = vmatmul.mubr.f32.gmra.mrb[2].mxu1 %v4453_v60  ;;  %3658 = vmatprep.subr.bf16.mxu0 %v3657_v7  ;;  %v2592_v60 = vld [vmem:[%s4915_s1 + $0x3b8] sm:$0xff] }
  0xbb   : > { %3297 = vmatmul.mubr.f32.gmra.mrb[2].mxu0 %v4526_v31  ;;  %3532 = vmatpush3.bf16.msra.mxu1 %v3529_v4  ;;  %v3665_v42 = vpack.c.bf16 %v2592_v60, %v2591_v52  ;;  %v2595_v4 = vld [vmem:[%s4915_s1 + $0x3d0] sm:$0xff] }
  0xbc   : > { %3660 = vmatpush3.bf16.msra.mxu0 %v3657_v7  ;;  %3075 = vmatprep.mubr.f32.mxu1 %v4460_v63  ;;  %v2596_v7 = vld [vmem:[%s4915_s1 + $0x3d8] sm:$0xff]  ;;  %v2471_v60 = vld [vmem:[%s4915_s1 + $0x1f0] sm:$0xff] }
  0xbd   : > { %3299 = vmatprep.mubr.f32.mxu0 %v4540_v37  ;;  %3534 = vmatprep.subr.bf16.mxu1 %v3533_v28  ;;  %v3673_v14 = vpack.c.bf16 %v2596_v7, %v2595_v4  ;;  %v2619_v7 = vld [vmem:[%s4915_s1 + $0x410] sm:$0xff] }
  0xbe   : > { %3076 = vmatmul.mubr.f32.gmra.mrb[4].mxu1 %v4480_v8  ;;  %3662 = vmatprep.subr.bf16.mxu0 %v3661_v30 }
  0xbf   : > { %3300 = vmatmul.mubr.f32.gmra.mrb[4].mxu0 %v4554_v45  ;;  %3536 = vmatpush3.bf16.msra.mxu1 %v3533_v28  ;;  %v2597_v28 = vld [vmem:[%s4915_s1 + $0x3e0] sm:$0xff] }
  0xc0   : > { %3664 = vmatpush3.bf16.msra.mxu0 %v3661_v30  ;;  %3078 = vmatprep.mubr.f32.mxu1 %v4488_v13  ;;  %v2598_v30 = vld [vmem:[%s4915_s1 + $0x3e8] sm:$0xff] }
  0xc1   : > { %3302 = vmatprep.mubr.f32.mxu0 %v4568_v50  ;;  %3538 = vmatprep.subr.bf16.mxu1 %v3537_v40  ;;  %v3677_v52 = vpack.c.bf16 %v2598_v30, %v2597_v28 }
  0xc2   : > { %3079 = vmatmul.mubr.f32.gmra.mrb[6].mxu1 %v4508_v22  ;;  %3666 = vmatprep.subr.bf16.mxu0 %v3665_v42 }
  0xc3   : > { %3303 = vmatmul.mubr.f32.gmra.mrb[6].mxu0 %v4582_v57  ;;  %3540 = vmatpush3.bf16.msra.mxu1 %v3537_v40  ;;  %v2472_v40 = vld [vmem:[%s4915_s1 + $0x1f8] sm:$0xff] }
  0xc4   : > { %3668 = vmatpush3.bf16.msra.mxu0 %v3665_v42  ;;  %3081 = vmatprep.mubr.f32.mxu1 %v4516_v26  ;;  %v2599_v42 = vld [vmem:[%s4915_s1 + $0x3f0] sm:$0xff]  ;;  %v3553_v51 = vpack.c.bf16 %v2472_v40, %v2471_v60 }
  0xc5   : > { %3305 = vmatprep.mubr.f32.mxu0 %v4596_v2  ;;  %3542 = vmatprep.subr.bf16.mxu1 %v3541_v55 }
  0xc6   : > { %3082 = vmatmul.mubr.f32.gmra.mrb[8].mxu1 %v4536_v36  ;;  %3670 = vmatprep.subr.bf16.mxu0 %v3669_v56 }
  0xc7   : > { %3306 = vmatmul.mubr.f32.gmra.mrb[8].mxu0 %v4610_v15  ;;  %3544 = vmatpush3.bf16.msra.mxu1 %v3541_v55  ;;  %v3681_v55 = vpack.c.bf16 %v2600_v46, %v2599_v42 }
  0xc8   : > { %3672 = vmatpush3.bf16.msra.mxu0 %v3669_v56  ;;  %3084 = vmatprep.mubr.f32.mxu1 %v4544_v39  ;;  %v2617_v56 = vld [vmem:[%s4915_s1 + $0x400] sm:$0xff] }
  0xc9   : > { %3308 = vmatprep.mubr.f32.mxu0 %v4624_v24  ;;  %3546 = vmatprep.subr.bf16.mxu1 %v3545_v12  ;;  %v3685_v4 = vpack.c.bf16 %v2618_v58, %v2617_v56 }
  0xca   : > { %3085 = vmatmul.mubr.f32.gmra.mrb[10].mxu1 %v4564_v48  ;;  %3674 = vmatprep.subr.bf16.mxu0 %v3673_v14 }
  0xcb   : > { %3309 = vmatmul.mubr.f32.gmra.mrb[10].mxu0 %v4638_v38  ;;  %3548 = vmatpush3.bf16.msra.mxu1 %v3545_v12  ;;  %v2620_v12 = vld [vmem:[%s4915_s1 + $0x418] sm:$0xff] }
  0xcc   : > { %3676 = vmatpush3.bf16.msra.mxu0 %v3673_v14  ;;  %3087 = vmatprep.mubr.f32.mxu1 %v4572_v53  ;;  %v3689_v14 = vpack.c.bf16 %v2620_v12, %v2619_v7 }
  0xcd   : > { %3311 = vmatprep.mubr.f32.mxu0 %v4749_v34  ;;  %3550 = vmatprep.subr.bf16.mxu1 %v3549_v32 }
  0xce   : > { %3088 = vmatmul.mubr.f32.gmra.mrb[12].mxu1 %v4592_v0  ;;  %3678 = vmatprep.subr.bf16.mxu0 %v3677_v52 }
  0xcf   : > { %3312 = vmatmul.mubr.f32.gmra.mrb[12].mxu0 %v4766_v47  ;;  %3552 = vmatpush3.bf16.msra.mxu1 %v3549_v32 }
  0xd0   : > { %3680 = vmatpush3.bf16.msra.mxu0 %v3677_v52  ;;  %3090 = vmatprep.mubr.f32.mxu1 %v4600_v6 }
  0xd1   : > { %3314 = vmatprep.mubr.f32.mxu0 %v2551_v54  ;;  %3554 = vmatprep.subr.bf16.mxu1 %v3553_v51 }
  0xd2   : > { %3091 = vmatmul.mubr.f32.gmra.mrb[14].mxu1 %v4620_v21  ;;  %3682 = vmatprep.subr.bf16.mxu0 %v3681_v55 }
  0xd3   : > { %3315 = vmatmul.mubr.f32.gmra.mrb[14].mxu0 %v2552_v62  ;;  %3556 = vmatpush3.bf16.msra.mxu1 %v3553_v51 }
  0xd4   : > { %3684 = vmatpush3.bf16.msra.mxu0 %v3681_v55  ;;  %3125 = vmatprep.mubr.f32.mxu1 %v4457_v61  ;;  %v2623_v61 = vld [vmem:[%s4915_s1 + $0x430] sm:$0xff] }
  0xd5   : > { %3349 = vmatprep.mubr.f32.mxu0 %v4283_v59  ;;  %3686 = vmatprep.subr.bf16.mxu0 %v3685_v4  ;;  %v3693_v59 = vpack.c.bf16 %v2622_v20, %v2621_v16 }
  0xd6   : > { %3126 = vmatmul.mubr.f32.vlgmr.msra.gmra.mrb[0].mxu1 %v4470_v5  ;;  %3717 = vmatprep.subr.bf16.mxu1 %v3685_v4  ;;  %v2624_v5 = vld [vmem:[%s4915_s1 + $0x438] sm:$0xff] }
  0xd7   : > { %3350 = vmatmul.mubr.f32.vlgmr.msra.gmra.mrb[0].mxu0 %v4299_v1  ;;  %3725 = vmatpush3.bf16.msra.mxu1 %v3685_v4  ;;  %v3697_v1 = vpack.c.bf16 %v2624_v5, %v2623_v61 }
  0xd8   : > { %3688 = vmatpush3.bf16.msra.mxu0 %v3685_v4  ;;  %3128 = vmatprep.mubr.f32.mxu1 %v4484_v10  ;;  %v2626_v10 = vld [vmem:[%s4915_s1 + $0x448] sm:$0xff] }
  0xd9   : > { %3352 = vmatprep.mubr.f32.mxu0 %v4303_v3  ;;  %3690 = vmatprep.subr.bf16.mxu0 %v3689_v14  ;;  %v2625_v3 = vld [vmem:[%s4915_s1 + $0x440] sm:$0xff] }
  0xda   : > { %3129 = vmatmul.mubr.f32.gmra.mrb[2].mxu1 %v4498_v18  ;;  %3718 = vmatprep.subr.bf16.mxu1 %v3689_v14  ;;  %v2628_v18 = vld [vmem:[%s4915_s1 + $0x458] sm:$0xff] }
  0xdb   : > { %3353 = vmatmul.mubr.f32.gmra.mrb[2].mxu0 %v4320_v9  ;;  %3726 = vmatpush3.bf16.msra.mxu1 %v3689_v14  ;;  %v3701_v9 = vpack.c.bf16 %v2626_v10, %v2625_v3 }
  0xdc   : > { %3692 = vmatpush3.bf16.msra.mxu0 %v3689_v14  ;;  %3131 = vmatprep.mubr.f32.mxu1 %v4512_v23  ;;  %v2630_v23 = vld [vmem:[%s4915_s1 + $0x468] sm:$0xff] }
  0xdd   : > { %3355 = vmatprep.mubr.f32.mxu0 %v4325_v11  ;;  %3694 = vmatprep.subr.bf16.mxu0 %v3693_v59  ;;  %v2627_v11 = vld [vmem:[%s4915_s1 + $0x450] sm:$0xff] }
  0xde   : > { %3132 = vmatmul.mubr.f32.gmra.mrb[4].mxu1 %v4526_v31  ;;  %3719 = vmatprep.subr.bf16.mxu1 %v3693_v59  ;;  %v2583_v31 = vld [vmem:[%s4152_s6 + $0xd9] sm:$0xff] }
  0xdf   : > { %3356 = vmatmul.mubr.f32.gmra.mrb[4].mxu0 %v4342_v17  ;;  %3727 = vmatpush3.bf16.msra.mxu1 %v3693_v59  ;;  %v3705_v17 = vpack.c.bf16 %v2628_v18, %v2627_v11 }
  0xe0   : > { %3696 = vmatpush3.bf16.msra.mxu0 %v3693_v59  ;;  %3134 = vmatprep.mubr.f32.mxu1 %v4540_v37  ;;  %v2584_v37 = vld [vmem:[%s4152_s6 + $0xe1] sm:$0xff] }
  0xe1   : > { %3358 = vmatprep.mubr.f32.mxu0 %v4347_v19  ;;  %3698 = vmatprep.subr.bf16.mxu0 %v3697_v1  ;;  %v2629_v19 = vld [vmem:[%s4915_s1 + $0x460] sm:$0xff] }
  0xe2   : > { %3135 = vmatmul.mubr.f32.gmra.mrb[6].mxu1 %v4554_v45  ;;  %3720 = vmatprep.subr.bf16.mxu1 %v3697_v1 }
  0xe3   : > { %3359 = vmatmul.mubr.f32.gmra.mrb[6].mxu0 %v4364_v25  ;;  %3728 = vmatpush3.bf16.msra.mxu1 %v3697_v1  ;;  %v3709_v25 = vpack.c.bf16 %v2630_v23, %v2629_v19 }
  0xe4   : > { %3700 = vmatpush3.bf16.msra.mxu0 %v3697_v1  ;;  %3137 = vmatprep.mubr.f32.mxu1 %v4568_v50 }
  0xe5   : > { %3361 = vmatprep.mubr.f32.mxu0 %v4369_v27  ;;  %3702 = vmatprep.subr.bf16.mxu0 %v3701_v9  ;;  %v2631_v27 = vld [vmem:[%s4915_s1 + $0x470] sm:$0xff] }
  0xe6   : > { %3138 = vmatmul.mubr.f32.gmra.mrb[8].mxu1 %v4582_v57  ;;  %3721 = vmatprep.subr.bf16.mxu1 %v3701_v9 }
  0xe7   : > { %3362 = vmatmul.mubr.f32.gmra.mrb[8].mxu0 %v4386_v33  ;;  %3729 = vmatpush3.bf16.msra.mxu1 %v3701_v9  ;;  %v2632_v33 = vld [vmem:[%s4915_s1 + $0x478] sm:$0xff] }
  0xe8   : > { %3704 = vmatpush3.bf16.msra.mxu0 %v3701_v9  ;;  %3140 = vmatprep.mubr.f32.mxu1 %v4596_v2 }
  0xe9   : > { %3364 = vmatprep.mubr.f32.mxu0 %v4391_v35  ;;  %3706 = vmatprep.subr.bf16.mxu0 %v3705_v17  ;;  %v3713_v35 = vpack.c.bf16 %v2632_v33, %v2631_v27 }
  0xea   : > { %3141 = vmatmul.mubr.f32.gmra.mrb[10].mxu1 %v4610_v15  ;;  %3722 = vmatprep.subr.bf16.mxu1 %v3705_v17 }
  0xeb   : > { %3365 = vmatmul.mubr.f32.gmra.mrb[10].mxu0 %v4408_v41  ;;  %3730 = vmatpush3.bf16.msra.mxu1 %v3705_v17  ;;  %v2615_v41 = vld [vmem:[%s4152_s6 + $0xda] sm:$0xff] }
  0xec   : > { %3708 = vmatpush3.bf16.msra.mxu0 %v3705_v17  ;;  %3143 = vmatprep.mubr.f32.mxu1 %v4624_v24 }
  0xed   : > { %3367 = vmatprep.mubr.f32.mxu0 %v4413_v43  ;;  %3710 = vmatprep.subr.bf16.mxu0 %v3709_v25  ;;  %v2616_v43 = vld [vmem:[%s4152_s6 + $0xe2] sm:$0xff] }
  0xee   : > { %3144 = vmatmul.mubr.f32.gmra.mrb[12].mxu1 %v4638_v38  ;;  %3723 = vmatprep.subr.bf16.mxu1 %v3709_v25 }
  0xef   : > { %3368 = vmatmul.mubr.f32.gmra.mrb[12].mxu0 %v4430_v49  ;;  %3731 = vmatpush3.bf16.msra.mxu1 %v3709_v25 }
  0xf0   : > { %3712 = vmatpush3.bf16.msra.mxu0 %v3709_v25  ;;  %3146 = vmatprep.mubr.f32.mxu1 %v4749_v34 }
  0xf1   : > { %3370 = vmatprep.mubr.f32.mxu0 %v2583_v31  ;;  %3714 = vmatprep.subr.bf16.mxu0 %v3713_v35 }
  0xf2   : > { %3147 = vmatmul.mubr.f32.gmra.mrb[14].mxu1 %v4766_v47  ;;  %3724 = vmatprep.subr.bf16.mxu1 %v3713_v35 }
  0xf3   : > { %3371 = vmatmul.mubr.f32.gmra.mrb[14].mxu0 %v2584_v37  ;;  %3732 = vmatpush3.bf16.msra.mxu1 %v3713_v35 }
  0xf4   : > { %3716 = vmatpush3.bf16.msra.mxu0 %v3713_v35  ;;  %3405 = vmatprep.mubr.f32.mxu0 %v4460_v63 }
  0xf5   : > { %3417 = vmatprep.mubr.f32.mxu1 %v4572_v53 }
  0xf6   : > { %3418 = vmatmul.mubr.f32.vlgmr.msra.gmra.mrb[16].mxu1 %v4592_v0 }
  0xf7   : > { %3406 = vmatmul.mubr.f32.vlgmr.msra.gmra.mrb[0].mxu0 %v4480_v8  ;;  %3420 = vmatprep.mubr.f32.mxu1 %v4600_v6 }
  0xf8   : > { %3408 = vmatprep.mubr.f32.mxu0 %v4488_v13 }
  0xfa   : > { %3421 = vmatmul.mubr.f32.gmra.mrb[18].mxu1 %v4620_v21 }
  0xfb   : > { %3409 = vmatmul.mubr.f32.gmra.mrb[2].mxu0 %v4508_v22  ;;  %3423 = vmatprep.mubr.f32.mxu1 %v4628_v29 }
  0xfc   : > { %3411 = vmatprep.mubr.f32.mxu0 %v4516_v26 }
  0xfe   : > { %3424 = vmatmul.mubr.f32.gmra.mrb[20].mxu1 %v4648_v44 }
  0xff   : > { %3412 = vmatmul.mubr.f32.gmra.mrb[4].mxu0 %v4536_v36  ;;  %3426 = vmatprep.mubr.f32.mxu1 %v2615_v41 }
 0x100   : > { %3414 = vmatprep.mubr.f32.mxu0 %v4544_v39 }
 0x102   : > { %3427 = vmatmul.mubr.f32.gmra.mrb[22].mxu1 %v2616_v43 }
 0x103   : > { %3415 = vmatmul.mubr.f32.gmra.mrb[6].mxu0 %v4564_v48 }
 0x1a9   : > { %v3127_v49 = vpop.f32.mrb[0].mxu1 }
 0x1aa   : > { %v1084_v63 = vpop.f32.mrb[1].mxu1 }
 0x1ad   : > { %v3130_v8 = vpop.f32.mrb[2].mxu1 }
 0x1ae   : > { %v1094_v13 = vpop.f32.mrb[3].mxu1 }
 0x1b1   : > { %v4871_v22 = vpop.f32.mrb[4].mxu1 }
 0x1b2   : > { %v4873_v45 = vpop.f32.mrb[5].mxu1 }
 0x1b5   : > { %v4875_v26 = vpop.f32.mrb[6].mxu1 }
 0x1b6   : > { %v4877_v50 = vpop.f32.mrb[7].mxu1 }
 0x1b9   : > { %v3139_v36 = vpop.f32.mrb[8].mxu1 }
 0x1ba   : > { %v3363_v53 = vpop.f32.mrb[8].mxu0  ;;  %v1124_v57 = vpop.f32.mrb[9].mxu1 }
 0x1bb   : > { %v3741_v0 = vadd.f32 %v3363_v53, %v3139_v36  ;;  %v1901_v39 = vpop.f32.mrb[9].mxu0 }
 0x1bc   : > { %v3743_v2 = vadd.f32 %v1901_v39, %v1124_v57 }
 0x1bd   : > { %v3142_v6 = vpop.f32.mrb[10].mxu1 }
 0x1be   : > { %v3366_v48 = vpop.f32.mrb[10].mxu0  ;;  %v1134_v15 = vpop.f32.mrb[11].mxu1 }
 0x1bf   : > { %v3745_v21 = vadd.f32 %v3366_v48, %v3142_v6  ;;  %v1911_v24 = vpop.f32.mrb[11].mxu0 }
 0x1c0   : > { %v3747_v29 = vadd.f32 %v1911_v24, %v1134_v15 }
 0x1c1   : > { %v3145_v38 = vpop.f32.mrb[12].mxu1 }
 0x1c2   : > { %v3369_v44 = vpop.f32.mrb[12].mxu0  ;;  %v1144_v28 = vpop.f32.mrb[13].mxu1 }
 0x1c3   : > { %v3749_v30 = vadd.f32 %v3369_v44, %v3145_v38  ;;  %v1921_v32 = vpop.f32.mrb[13].mxu0 }
 0x1c4   : > { %v3751_v34 = vadd.f32 %v1921_v32, %v1144_v28 }
 0x1c5   : > { %v3148_v52 = vpop.f32.mrb[14].mxu1 }
 0x1c6   : > { %v3372_v60 = vpop.f32.mrb[14].mxu0  ;;  %v1154_v40 = vpop.f32.mrb[15].mxu1 }
 0x1c7   : > { %v3753_v42 = vadd.f32 %v3372_v60, %v3148_v52  ;;  %v1931_v46 = vpop.f32.mrb[15].mxu0 }
 0x1c8   : > { %v3755_v47 = vadd.f32 %v1931_v46, %v1154_v40 }
 0x1c9   : > { %v3419_v51 = vpop.f32.mrb[16].mxu1 }
 0x1ca   : > { %v3407_v54 = vpop.f32.mrb[0].mxu0  ;;  %v3742_v55 = vadd.f32 %v3741_v0, %v3419_v51  ;;  %v2095_v56 = vpop.f32.mrb[17].mxu1 }
 0x1cb   : > { %v3733_v58 = vadd.f32 %v3407_v54, %v3127_v49  ;;  %v2055_v62 = vpop.f32.mrb[1].mxu0  ;;  %v3744_v4 = vadd.f32 %v3743_v2, %v2095_v56 }
 0x1cc   : > { %v2159_v7 = vmax.f32 %v3742_v55, 0.0  ;;  %v3734_v12 = vadd.f32 %v2055_v62, %v1084_v63 }
 0x1cd   : > { %v2151_v14 = vmax.f32 %v3733_v58, 0.0  ;;  %v2158_v16 = vmax.f32 %v3744_v4, 0.0  ;;  %v3422_v20 = vpop.f32.mrb[18].mxu1 }
 0x1ce   : > { %2175 = vst [vmem:[%s4001_s28 + $0x48] sm:$0xff] %v2159_v7  ;;  %v2150_v59 = vmax.f32 %v3734_v12, 0.0  ;;  %v3410_v61 = vpop.f32.mrb[2].mxu0  ;;  %v3746_v5 = vadd.f32 %v3745_v21, %v3422_v20  ;;  %v2105_v1 = vpop.f32.mrb[19].mxu1 }
 0x1cf   : > { %2167 = vst [vmem:[%s4001_s28 + $0x8] sm:$0xff] %v2151_v14  ;;  %2174 = vst [vmem:[%s4001_s28 + $0x40] sm:$0xff] %v2158_v16  ;;  %v3735_v3 = vadd.f32 %v3410_v61, %v3130_v8  ;;  %v2065_v10 = vpop.f32.mrb[3].mxu0  ;;  %v3748_v9 = vadd.f32 %v3747_v29, %v2105_v1 }
 0x1d0   : > { %2166 = vst [vmem:[%s4001_s28] sm:$0xff] %v2150_v59  ;;  %v2161_v11 = vmax.f32 %v3746_v5, 0.0  ;;  %v3736_v18 = vadd.f32 %v2065_v10, %v1094_v13 }
 0x1d1   : > { %v2153_v17 = vmax.f32 %v3735_v3, 0.0  ;;  %v2160_v19 = vmax.f32 %v3748_v9, 0.0  ;;  %v3425_v23 = vpop.f32.mrb[20].mxu1 }
 0x1d2   : > { %2177 = vst [vmem:[%s4001_s28 + $0x58] sm:$0xff] %v2161_v11  ;;  %v2152_v25 = vmax.f32 %v3736_v18, 0.0  ;;  %v3413_v27 = vpop.f32.mrb[4].mxu0  ;;  %v3750_v33 = vadd.f32 %v3749_v30, %v3425_v23  ;;  %v2115_v35 = vpop.f32.mrb[21].mxu1 }
 0x1d3   : > { %2169 = vst [vmem:[%s4001_s28 + $0x18] sm:$0xff] %v2153_v17  ;;  %2176 = vst [vmem:[%s4001_s28 + $0x50] sm:$0xff] %v2160_v19  ;;  %v3737_v31 = vadd.f32 %v3413_v27, %v4871_v22  ;;  %v2075_v37 = vpop.f32.mrb[5].mxu0  ;;  %v3752_v41 = vadd.f32 %v3751_v34, %v2115_v35 }
 0x1d4   : > { %2168 = vst [vmem:[%s4001_s28 + $0x10] sm:$0xff] %v2152_v25  ;;  %v2163_v43 = vmax.f32 %v3750_v33, 0.0  ;;  %v3738_v49 = vadd.f32 %v2075_v37, %v4873_v45 }
 0x1d5   : > { %v2155_v63 = vmax.f32 %v3737_v31, 0.0  ;;  %v2162_v8 = vmax.f32 %v3752_v41, 0.0  ;;  %v3428_v13 = vpop.f32.mrb[22].mxu1 }
 0x1d6   : > { %2179 = vst [vmem:[%s4001_s28 + $0x68] sm:$0xff] %v2163_v43  ;;  %v2154_v36 = vmax.f32 %v3738_v49, 0.0  ;;  %v3416_v53 = vpop.f32.mrb[6].mxu0  ;;  %v3754_v57 = vadd.f32 %v3753_v42, %v3428_v13  ;;  %v2125_v0 = vpop.f32.mrb[23].mxu1 }
 0x1d7   : > { %2171 = vst [vmem:[%s4001_s28 + $0x28] sm:$0xff] %v2155_v63  ;;  %2178 = vst [vmem:[%s4001_s28 + $0x60] sm:$0xff] %v2162_v8  ;;  %v3739_v22 = vadd.f32 %v3416_v53, %v4875_v26  ;;  %v2085_v39 = vpop.f32.mrb[7].mxu0  ;;  %v3756_v2 = vadd.f32 %v3755_v47, %v2125_v0 }
 0x1d8   : > { %2170 = vst [vmem:[%s4001_s28 + $0x20] sm:$0xff] %v2154_v36  ;;  %v2165_v45 = vmax.f32 %v3754_v57, 0.0  ;;  %v3740_v6 = vadd.f32 %v2085_v39, %v4877_v50 }
 0x1d9   : > { %v2157_v48 = vmax.f32 %v3739_v22, 0.0  ;;  %v2164_v15 = vmax.f32 %v3756_v2, 0.0 }
 0x1da   : > { %2181 = vst [vmem:[%s4001_s28 + $0x78] sm:$0xff] %v2165_v45  ;;  %v2156_v21 = vmax.f32 %v3740_v6, 0.0 }
 0x1db   : > { %2173 = vst [vmem:[%s4001_s28 + $0x38] sm:$0xff] %v2157_v48  ;;  %2180 = vst [vmem:[%s4001_s28 + $0x70] sm:$0xff] %v2164_v15 }
 0x1dc   : > { %2172 = vst [vmem:[%s4001_s28 + $0x30] sm:$0xff] %v2156_v21 }
 0x1dd PF: > { %s12_s13 = sadd.s32 1, %s3941_s13   ;;  %s4917_s9 = smov %s3933_s11 }
 0x1de   : > { %p9_p13 = scmp.ge.s32.totalorder %s12_s13, 6   ;;  %s4918_s10 = smov %s3937_s12 }
 0x1df   : > { %s4919_s11 = smov %s4922_s14  ;;  %s4920_s12 = smov %s4926_s15 }
 0x1e0   :  { %11 = sbr.rel (!%p9_p13) target bundleno = 3 (0x3), region = 180 }
 0x1e7   :  { %2214 = vsyncmov [#allocation3] }
 0x1ea   :  { %s2215_s28 = vpop.sfrf %2214 }
 0x1eb   :  { %p2635_p0 = scmp.ne.s32.totalorder %s2215_s28, 0 }
 0x1ed   :  { %2219 = shalt.err (%p2635_p0)  }
 0x1ee   :  { %2221 = vsyncmov [#allocation3 + $0x1] }
 0x1f1   :  { %s2222_s6 = vpop.sfrf %2221 }
 0x1f2   :  { %p2636_p1 = scmp.ne.s32.totalorder %s2222_s6, 0 }
 0x1f4   :  { %2226 = shalt.err (%p2636_p1)  }

</bundles_post_ra>
